<compile_context>
chip_gen: v7x
topology: tpu7x:2x2x1
jax: 0.10.0
libtpu: 0.0.40
codegen_flags: <defaults>
</compile_context>

<pallas_src>
import jax
import jax.numpy as jnp
import numpy as np
from jax import lax
from jax.experimental import pallas as pl
from jax.experimental.pallas import tpu as pltpu

_K = 7
_PAD = 3
_EPS = 1e-5


# ----------------------------- Pallas kernel ------------------------------- #

def _triplet_kernel(x_ref, w_ref, b_ref, o_ref,
                    ph_max, ph_mean, pw_max, pw_mean, ps_max, ps_mean):
    """Fused TripletAttention forward for one batch block.

    x_ref : (bb, C, H, W) VMEM  input batch block (native dtype)
    w_ref : (294,)        SMEM  BN-folded conv weights (width-gate kernel
                                pre-transposed in glue); layout g*98+ci*49+ki*7+kj
    b_ref : (3,)          SMEM  BN-folded additive constants per gate
    o_ref : (bb, C, H, W) VMEM  output block
    p*_*  : padded (+3 each side) f32 VMEM scratch for the pooled maps
    """
    bb, C, H, W = x_ref.shape
    xin = x_ref[...]                       # native dtype; no full f32 block copy

    # ---------- ChannelPool per gate, squeezed vreg-dense layouts ----------
    # height gate: reduce over H  -> (bb, C, W)
    h_mx = jnp.max(xin, axis=2).astype(jnp.float32)
    h_mn = jnp.sum(xin, axis=2, dtype=jnp.float32) * (1.0 / H)
    # width  gate: reduce over W  -> (bb, C, H)
    w_mx = jnp.max(xin, axis=3).astype(jnp.float32)
    w_mn = jnp.sum(xin, axis=3, dtype=jnp.float32) * (1.0 / W)
    # spatial gate: reduce over C -> (bb, H, W)
    s_mx = jnp.max(xin, axis=1).astype(jnp.float32)
    s_mn = jnp.sum(xin, axis=1, dtype=jnp.float32) * (1.0 / C)

    # ---------- zero padding via persistent VMEM scratch (no concatenate) ----
    for pref in (ph_max, ph_mean, pw_max, pw_mean, ps_max, ps_mean):
        pref[...] = jnp.zeros_like(pref)
    ph_max[:, _PAD:_PAD + C, _PAD:_PAD + W] = h_mx
    ph_mean[:, _PAD:_PAD + C, _PAD:_PAD + W] = h_mn
    pw_max[:, _PAD:_PAD + C, _PAD:_PAD + H] = w_mx
    pw_mean[:, _PAD:_PAD + C, _PAD:_PAD + H] = w_mn
    ps_max[:, _PAD:_PAD + H, _PAD:_PAD + W] = s_mx
    ps_mean[:, _PAD:_PAD + H, _PAD:_PAD + W] = s_mn

    def conv_gate(p_refs, g, rows, cols):
        # 7x7 conv (2->1 ch, pad 3) + folded eval-BN + y*sigmoid(y).
        # Bounded fori over ki (live-range friendly); taps stream from the
        # padded scratch refs (vld slot) with dynamic SMEM weight reads.
        def body(ki, acc):
            for ci in range(2):                       # ChannelPool order: [max, mean]
                pr = p_refs[ci]
                wbase = g * 98 + ci * 49 + ki * _K
                for kj in range(_K):
                    win = pr[:, pl.ds(ki, rows), pl.ds(kj, cols)]
                    acc = acc + win * w_ref[wbase + kj]
            return acc

        acc = lax.fori_loop(0, _K, body, jnp.zeros((bb, rows, cols), jnp.float32))
        y = acc + b_ref[g]                            # conv bias + eval BatchNorm folded
        return y * jax.nn.sigmoid(y)                  # SpatialGate: out * sigmoid(out)

    g1 = conv_gate((ph_max, ph_mean), 0, C, W)        # (bb, C, W)
    g2 = conv_gate((pw_max, pw_mean), 1, C, H)        # (bb, C, H), kernel pre-transposed
    g3 = conv_gate((ps_max, ps_mean), 2, H, W)        # (bb, H, W)

    # One broadcast/relayout per gate for the combine; single store per block.
    out = (g1[:, :, None, :] + g2[:, :, :, None] + g3[:, None, :, :]) * (1.0 / 3.0)
    o_ref[...] = out.astype(o_ref.dtype)


# ------------------------------ glue / wrapper ------------------------------ #

def _fold_gate(params, transpose_kernel):
    """Fold eval-mode BatchNorm2d(1) into the conv weights / bias."""
    w, cb, gamma, beta, rmean, rvar = params            # w: (1, 2, 7, 7)
    s = gamma[0] / jnp.sqrt(rvar[0] + _EPS)
    w_eff = w[0].astype(jnp.float32) * s                 # (2, 7, 7)
    if transpose_kernel:                                  # width gate: swap (ki, kj)
        w_eff = jnp.swapaxes(w_eff, 1, 2)
    b_eff = (cb[0] - rmean[0]) * s + beta[0]
    return w_eff.reshape(-1), b_eff


def _round_up(v, m):
    return -(-v // m) * m


def _block_vmem_bytes(bb, c, h, w, io_itemsize):
    """Per-grid-step VMEM estimate, rounded to (8,128) vreg tiles."""
    t = lambda r, cc: _round_up(max(r, 1), 8) * _round_up(max(cc, 1), 128)
    io = 2 * 2 * bb * c * t(h, w) * io_itemsize          # in + out, double-buffered
    upcast = 4 * bb * c * t(h, w)                        # f32 temp over the block (mean path)
    pads = 4 * 2 * bb * (t(c + 6, w + 6) + t(c + 6, h + 6) + t(h + 6, w + 6))
    gates = 4 * 4 * bb * (t(c, w) + t(c, h) + t(h, w))   # pooled maps + conv accumulators
    combine = 4 * bb * c * t(h, w)                       # f32 combine temp before downcast
    return io + upcast + pads + gates + combine


def _pick_batch_block(b, c, h, w, io_itemsize, budget_bytes):
    """Largest divisor of B fitting the budget; capped at B//2 so the grid has
    >= 2 steps and both v7x TensorCores are used under 'parallel' semantics."""
    cap = max(1, b // 2)
    bb = 1
    for cand in range(1, cap + 1):
        if b % cand == 0 and _block_vmem_bytes(cand, c, h, w, io_itemsize) <= budget_bytes:
            bb = cand
    return bb


def triplet_attention(x, params_h, params_w, params_s, *, budget_bytes=24 << 20):
    """x: (B, C, H, W) NCHW, spatial=True branch of TripletAttention.

    NOTE: BatchNorm is applied in eval mode (running statistics folded into the
    conv).  Do not use this kernel for training-mode BN.
    """
    b, c, h, w = x.shape
    w1, b1 = _fold_gate(params_h, transpose_kernel=False)
    w2, b2 = _fold_gate(params_w, transpose_kernel=True)
    w3, b3 = _fold_gate(params_s, transpose_kernel=False)
    wflat = jnp.concatenate([w1, w2, w3]).astype(jnp.float32)    # (294,)
    bflat = jnp.stack([b1, b2, b3]).astype(jnp.float32)          # (3,)

    io_itemsize = jnp.dtype(x.dtype).itemsize
    bb = _pick_batch_block(b, c, h, w, io_itemsize, budget_bytes)
    est = _block_vmem_bytes(bb, c, h, w, io_itemsize)
    # Headroom above the estimate, but stay below v7x's 64 MiB physical VMEM.
    vmem_limit = int(min(56 << 20, max(24 << 20, int(est * 1.25))))

    scratch = [
        pltpu.VMEM((bb, c + 2 * _PAD, w + 2 * _PAD), jnp.float32),   # ph_max
        pltpu.VMEM((bb, c + 2 * _PAD, w + 2 * _PAD), jnp.float32),   # ph_mean
        pltpu.VMEM((bb, c + 2 * _PAD, h + 2 * _PAD), jnp.float32),   # pw_max
        pltpu.VMEM((bb, c + 2 * _PAD, h + 2 * _PAD), jnp.float32),   # pw_mean
        pltpu.VMEM((bb, h + 2 * _PAD, w + 2 * _PAD), jnp.float32),   # ps_max
        pltpu.VMEM((bb, h + 2 * _PAD, w + 2 * _PAD), jnp.float32),   # ps_mean
    ]

    return pl.pallas_call(
        _triplet_kernel,
        out_shape=jax.ShapeDtypeStruct((b, c, h, w), x.dtype),
        grid=(b // bb,),
        in_specs=[
            pl.BlockSpec((bb, c, h, w), lambda i: (i, 0, 0, 0)),
            pl.BlockSpec(memory_space=pltpu.MemorySpace.SMEM),
            pl.BlockSpec(memory_space=pltpu.MemorySpace.SMEM),
        ],
        out_specs=pl.BlockSpec((bb, c, h, w), lambda i: (i, 0, 0, 0)),
        scratch_shapes=scratch,
        compiler_params=pltpu.CompilerParams(
            dimension_semantics=("parallel",),
            vmem_limit_bytes=vmem_limit,
        ),
    )(x, wflat, bflat)


# ------------------------------ reference (JAX) ----------------------------- #

def _gate_ref(xp, params):
    w, cb, gamma, beta, rmean, rvar = params
    pooled = jnp.concatenate(
        [jnp.max(xp, axis=1, keepdims=True), jnp.mean(xp, axis=1, keepdims=True)],
        axis=1)
    conv = lax.conv_general_dilated(
        pooled, w, window_strides=(1, 1), padding=[(3, 3), (3, 3)],
        dimension_numbers=("NCHW", "OIHW", "NCHW")) + cb.reshape(1, 1, 1, 1)
    y = (conv - rmean) / jnp.sqrt(rvar + _EPS) * gamma + beta
    return y * jax.nn.sigmoid(y)


def _triplet_ref(x, params_h, params_w, params_s):
    o1 = jnp.transpose(_gate_ref(jnp.transpose(x, (0, 2, 1, 3)), params_h), (0, 2, 1, 3))
    o2 = jnp.transpose(_gate_ref(jnp.transpose(x, (0, 3, 2, 1)), params_w), (0, 3, 2, 1))
    o3 = _gate_ref(x, params_s)
    return (1.0 / 3.0) * (o1 + o2 + o3)


# --------------------------------- params ----------------------------------- #

def _init_gate_params(key):
    k1, k2, k3, k4, k5, k6 = jax.random.split(key, 6)
    conv_w = (0.1 * jax.random.normal(k1, (1, 2, 7, 7))).astype(jnp.float32)
    conv_b = (0.1 * jax.random.normal(k2, (1,))).astype(jnp.float32)
    gamma = (1.0 + 0.1 * jax.random.normal(k3, (1,))).astype(jnp.float32)
    beta = (0.1 * jax.random.normal(k4, (1,))).astype(jnp.float32)
    rmean = (0.1 * jax.random.normal(k5, (1,))).astype(jnp.float32)
    rvar = (1.0 + 0.1 * jax.random.uniform(k6, (1,))).astype(jnp.float32)
    return conv_w, conv_b, gamma, beta, rmean, rvar


if __name__ == "__main__":
    B, C, H, W = 2, 8, 16, 16
    root = jax.random.PRNGKey(0)
    kx, kh, kw, ks = jax.random.split(root, 4)
    x = jax.random.normal(kx, (B, C, H, W), dtype=jnp.float32)
    params_h = _init_gate_params(kh)   # height_gate
    params_w = _init_gate_params(kw)   # width_gate
    params_s = _init_gate_params(ks)   # spatial_gate

    out = jax.block_until_ready(triplet_attention(x, params_h, params_w, params_s))

    ref = _triplet_ref(x, params_h, params_w, params_s)
    assert out.shape == (B, C, H, W)
    np.testing.assert_allclose(np.asarray(out), np.asarray(ref), rtol=1e-3, atol=1e-3)
    print("KERNEL_OK")
</pallas_src>

<mosaic_0001>
module attributes {stable_mosaic.version = 11 : i64} {
  func.func @_triplet_kernel(%arg0: i32, %arg1: memref<1x8x16x16xf32, #tpu.memory_space<vmem>>, %arg2: memref<294xf32, #tpu.memory_space<smem>>, %arg3: memref<3xf32, #tpu.memory_space<smem>>, %arg4: memref<1x8x16x16xf32, #tpu.memory_space<vmem>>, %arg5: memref<1x14x22xf32, #tpu.memory_space<vmem>>, %arg6: memref<1x14x22xf32, #tpu.memory_space<vmem>>, %arg7: memref<1x14x22xf32, #tpu.memory_space<vmem>>, %arg8: memref<1x14x22xf32, #tpu.memory_space<vmem>>, %arg9: memref<1x22x22xf32, #tpu.memory_space<vmem>>, %arg10: memref<1x22x22xf32, #tpu.memory_space<vmem>>) attributes {dimension_semantics = [#tpu.dimension_semantics<parallel>], iteration_bounds = array<i64: 2>, scalar_prefetch = 0 : i64, scratch_operands = 6 : i64, tpu.core_type = #tpu.core_type<tc>, window_params = [{transform_indices = @transform_0, window_bounds = array<i64: 1, 8, 16, 16>}, {transform_indices = @transform_1, window_bounds = array<i64: 294>}, {transform_indices = @transform_2, window_bounds = array<i64: 3>}, {transform_indices = @transform_3, window_bounds = array<i64: 1, 8, 16, 16>}]} {
    %c0 = arith.constant 0 : index
    %c0_0 = arith.constant 0 : index
    %c0_1 = arith.constant 0 : index
    %c0_2 = arith.constant 0 : index
    %0 = vector.load %arg1[%c0, %c0_0, %c0_1, %c0_2] : memref<1x8x16x16xf32, #tpu.memory_space<vmem>>, vector<1x8x16x16xf32>
    %cst = arith.constant dense<0xFF800000> : vector<1x8x16xf32>
    %1 = vector.multi_reduction <maximumf>, %0, %cst [2] : vector<1x8x16x16xf32> to vector<1x8x16xf32>
    %cst_3 = arith.constant dense<0.000000e+00> : vector<1x8x16xf32>
    %2 = vector.multi_reduction <add>, %0, %cst_3 [2] : vector<1x8x16x16xf32> to vector<1x8x16xf32>
    %cst_4 = arith.constant 6.250000e-02 : f32
    %3 = vector.broadcast %cst_4 : f32 to vector<1x8x16xf32>
    %4 = arith.mulf %2, %3 : vector<1x8x16xf32>
    %cst_5 = arith.constant dense<0xFF800000> : vector<1x8x16xf32>
    %5 = vector.multi_reduction <maximumf>, %0, %cst_5 [3] : vector<1x8x16x16xf32> to vector<1x8x16xf32>
    %cst_6 = arith.constant dense<0.000000e+00> : vector<1x8x16xf32>
    %6 = vector.multi_reduction <add>, %0, %cst_6 [3] : vector<1x8x16x16xf32> to vector<1x8x16xf32>
    %cst_7 = arith.constant 6.250000e-02 : f32
    %7 = vector.broadcast %cst_7 : f32 to vector<1x8x16xf32>
    %8 = arith.mulf %6, %7 : vector<1x8x16xf32>
    %cst_8 = arith.constant dense<0xFF800000> : vector<1x16x16xf32>
    %9 = vector.multi_reduction <maximumf>, %0, %cst_8 [1] : vector<1x8x16x16xf32> to vector<1x16x16xf32>
    %cst_9 = arith.constant dense<0.000000e+00> : vector<1x16x16xf32>
    %10 = vector.multi_reduction <add>, %0, %cst_9 [1] : vector<1x8x16x16xf32> to vector<1x16x16xf32>
    %cst_10 = arith.constant 1.250000e-01 : f32
    %11 = vector.broadcast %cst_10 : f32 to vector<1x16x16xf32>
    %12 = arith.mulf %10, %11 : vector<1x16x16xf32>
    %cst_11 = arith.constant 0.000000e+00 : f32
    %13 = vector.broadcast %cst_11 : f32 to vector<1x14x22xf32>
    %c0_12 = arith.constant 0 : index
    %c0_13 = arith.constant 0 : index
    %c0_14 = arith.constant 0 : index
    %14 = vector.load %arg5[%c0_12, %c0_13, %c0_14] : memref<1x14x22xf32, #tpu.memory_space<vmem>>, vector<1x14x22xf32>
    tpu.vector_store %arg5[%c0_12, %c0_13, %c0_14], %13 {strides = array<i32>} : memref<1x14x22xf32, #tpu.memory_space<vmem>>, vector<1x14x22xf32>,
    %cst_15 = arith.constant 0.000000e+00 : f32
    %15 = vector.broadcast %cst_15 : f32 to vector<1x14x22xf32>
    %c0_16 = arith.constant 0 : index
    %c0_17 = arith.constant 0 : index
    %c0_18 = arith.constant 0 : index
    %16 = vector.load %arg6[%c0_16, %c0_17, %c0_18] : memref<1x14x22xf32, #tpu.memory_space<vmem>>, vector<1x14x22xf32>
    tpu.vector_store %arg6[%c0_16, %c0_17, %c0_18], %15 {strides = array<i32>} : memref<1x14x22xf32, #tpu.memory_space<vmem>>, vector<1x14x22xf32>,
    %cst_19 = arith.constant 0.000000e+00 : f32
    %17 = vector.broadcast %cst_19 : f32 to vector<1x14x22xf32>
    %c0_20 = arith.constant 0 : index
    %c0_21 = arith.constant 0 : index
    %c0_22 = arith.constant 0 : index
    %18 = vector.load %arg7[%c0_20, %c0_21, %c0_22] : memref<1x14x22xf32, #tpu.memory_space<vmem>>, vector<1x14x22xf32>
    tpu.vector_store %arg7[%c0_20, %c0_21, %c0_22], %17 {strides = array<i32>} : memref<1x14x22xf32, #tpu.memory_space<vmem>>, vector<1x14x22xf32>,
    %cst_23 = arith.constant 0.000000e+00 : f32
    %19 = vector.broadcast %cst_23 : f32 to vector<1x14x22xf32>
    %c0_24 = arith.constant 0 : index
    %c0_25 = arith.constant 0 : index
    %c0_26 = arith.constant 0 : index
    %20 = vector.load %arg8[%c0_24, %c0_25, %c0_26] : memref<1x14x22xf32, #tpu.memory_space<vmem>>, vector<1x14x22xf32>
    tpu.vector_store %arg8[%c0_24, %c0_25, %c0_26], %19 {strides = array<i32>} : memref<1x14x22xf32, #tpu.memory_space<vmem>>, vector<1x14x22xf32>,
    %cst_27 = arith.constant 0.000000e+00 : f32
    %21 = vector.broadcast %cst_27 : f32 to vector<1x22x22xf32>
    %c0_28 = arith.constant 0 : index
    %c0_29 = arith.constant 0 : index
    %c0_30 = arith.constant 0 : index
    %22 = vector.load %arg9[%c0_28, %c0_29, %c0_30] : memref<1x22x22xf32, #tpu.memory_space<vmem>>, vector<1x22x22xf32>
    tpu.vector_store %arg9[%c0_28, %c0_29, %c0_30], %21 {strides = array<i32>} : memref<1x22x22xf32, #tpu.memory_space<vmem>>, vector<1x22x22xf32>,
    %cst_31 = arith.constant 0.000000e+00 : f32
    %23 = vector.broadcast %cst_31 : f32 to vector<1x22x22xf32>
    %c0_32 = arith.constant 0 : index
    %c0_33 = arith.constant 0 : index
    %c0_34 = arith.constant 0 : index
    %24 = vector.load %arg10[%c0_32, %c0_33, %c0_34] : memref<1x22x22xf32, #tpu.memory_space<vmem>>, vector<1x22x22xf32>
    tpu.vector_store %arg10[%c0_32, %c0_33, %c0_34], %23 {strides = array<i32>} : memref<1x22x22xf32, #tpu.memory_space<vmem>>, vector<1x22x22xf32>,
    %c0_35 = arith.constant 0 : index
    %c3 = arith.constant 3 : index
    %c3_36 = arith.constant 3 : index
    %25 = vector.load %arg5[%c0_35, %c3, %c3_36] : memref<1x14x22xf32, #tpu.memory_space<vmem>>, vector<1x8x16xf32>
    tpu.vector_store %arg5[%c0_35, %c3, %c3_36], %1 {strides = array<i32>} : memref<1x14x22xf32, #tpu.memory_space<vmem>>, vector<1x8x16xf32>,
    %c0_37 = arith.constant 0 : index
    %c3_38 = arith.constant 3 : index
    %c3_39 = arith.constant 3 : index
    %26 = vector.load %arg6[%c0_37, %c3_38, %c3_39] : memref<1x14x22xf32, #tpu.memory_space<vmem>>, vector<1x8x16xf32>
    tpu.vector_store %arg6[%c0_37, %c3_38, %c3_39], %4 {strides = array<i32>} : memref<1x14x22xf32, #tpu.memory_space<vmem>>, vector<1x8x16xf32>,
    %c0_40 = arith.constant 0 : index
    %c3_41 = arith.constant 3 : index
    %c3_42 = arith.constant 3 : index
    %27 = vector.load %arg7[%c0_40, %c3_41, %c3_42] : memref<1x14x22xf32, #tpu.memory_space<vmem>>, vector<1x8x16xf32>
    tpu.vector_store %arg7[%c0_40, %c3_41, %c3_42], %5 {strides = array<i32>} : memref<1x14x22xf32, #tpu.memory_space<vmem>>, vector<1x8x16xf32>,
    %c0_43 = arith.constant 0 : index
    %c3_44 = arith.constant 3 : index
    %c3_45 = arith.constant 3 : index
    %28 = vector.load %arg8[%c0_43, %c3_44, %c3_45] : memref<1x14x22xf32, #tpu.memory_space<vmem>>, vector<1x8x16xf32>
    tpu.vector_store %arg8[%c0_43, %c3_44, %c3_45], %8 {strides = array<i32>} : memref<1x14x22xf32, #tpu.memory_space<vmem>>, vector<1x8x16xf32>,
    %c0_46 = arith.constant 0 : index
    %c3_47 = arith.constant 3 : index
    %c3_48 = arith.constant 3 : index
    %29 = vector.load %arg9[%c0_46, %c3_47, %c3_48] : memref<1x22x22xf32, #tpu.memory_space<vmem>>, vector<1x16x16xf32>
    tpu.vector_store %arg9[%c0_46, %c3_47, %c3_48], %9 {strides = array<i32>} : memref<1x22x22xf32, #tpu.memory_space<vmem>>, vector<1x16x16xf32>,
    %c0_49 = arith.constant 0 : index
    %c3_50 = arith.constant 3 : index
    %c3_51 = arith.constant 3 : index
    %30 = vector.load %arg10[%c0_49, %c3_50, %c3_51] : memref<1x22x22xf32, #tpu.memory_space<vmem>>, vector<1x16x16xf32>
    tpu.vector_store %arg10[%c0_49, %c3_50, %c3_51], %12 {strides = array<i32>} : memref<1x22x22xf32, #tpu.memory_space<vmem>>, vector<1x16x16xf32>,
    %cst_52 = arith.constant 0.000000e+00 : f32
    %31 = vector.broadcast %cst_52 : f32 to vector<1x8x16xf32>
    %c0_i32 = arith.constant 0 : i32
    %c7_i32 = arith.constant 7 : i32
    %32 = arith.addi %c0_i32, %c7_i32 : i32
    %c1_i32 = arith.constant 1 : i32
    %33 = scf.for %arg11 = %c0_i32 to %32 step %c1_i32 iter_args(%arg12 = %31) -> (vector<1x8x16xf32>)  : i32 {
      %c7_i32_73 = arith.constant 7 : i32
      %78 = arith.muli %arg11, %c7_i32_73 : i32
      %c0_i32_74 = arith.constant 0 : i32
      %79 = arith.addi %c0_i32_74, %78 : i32
      %c0_75 = arith.constant 0 : index
      %80 = arith.index_cast %arg11 : i32 to index
      %c0_76 = arith.constant 0 : index
      %81 = vector.load %arg5[%c0_75, %80, %c0_76] : memref<1x14x22xf32, #tpu.memory_space<vmem>>, vector<1x8x16xf32>
      %c0_i32_77 = arith.constant 0 : i32
      %82 = arith.addi %79, %c0_i32_77 : i32
      %83 = arith.index_cast %82 : i32 to index
      %84 = memref.load %arg2[%83] : memref<294xf32, #tpu.memory_space<smem>>
      %85 = vector.broadcast %84 : f32 to vector<1x8x16xf32>
      %86 = arith.mulf %81, %85 : vector<1x8x16xf32>
      %87 = arith.addf %arg12, %86 : vector<1x8x16xf32>
      %c0_78 = arith.constant 0 : index
      %88 = arith.index_cast %arg11 : i32 to index
      %c1_79 = arith.constant 1 : index
      %89 = vector.load %arg5[%c0_78, %88, %c1_79] : memref<1x14x22xf32, #tpu.memory_space<vmem>>, vector<1x8x16xf32>
      %c1_i32_80 = arith.constant 1 : i32
      %90 = arith.addi %79, %c1_i32_80 : i32
      %91 = arith.index_cast %90 : i32 to index
      %92 = memref.load %arg2[%91] : memref<294xf32, #tpu.memory_space<smem>>
      %93 = vector.broadcast %92 : f32 to vector<1x8x16xf32>
      %94 = arith.mulf %89, %93 : vector<1x8x16xf32>
      %95 = arith.addf %87, %94 : vector<1x8x16xf32>
      %c0_81 = arith.constant 0 : index
      %96 = arith.index_cast %arg11 : i32 to index
      %c2_82 = arith.constant 2 : index
      %97 = vector.load %arg5[%c0_81, %96, %c2_82] : memref<1x14x22xf32, #tpu.memory_space<vmem>>, vector<1x8x16xf32>
      %c2_i32 = arith.constant 2 : i32
      %98 = arith.addi %79, %c2_i32 : i32
      %99 = arith.index_cast %98 : i32 to index
      %100 = memref.load %arg2[%99] : memref<294xf32, #tpu.memory_space<smem>>
      %101 = vector.broadcast %100 : f32 to vector<1x8x16xf32>
      %102 = arith.mulf %97, %101 : vector<1x8x16xf32>
      %103 = arith.addf %95, %102 : vector<1x8x16xf32>
      %c0_83 = arith.constant 0 : index
      %104 = arith.index_cast %arg11 : i32 to index
      %c3_84 = arith.constant 3 : index
      %105 = vector.load %arg5[%c0_83, %104, %c3_84] : memref<1x14x22xf32, #tpu.memory_space<vmem>>, vector<1x8x16xf32>
      %c3_i32 = arith.constant 3 : i32
      %106 = arith.addi %79, %c3_i32 : i32
      %107 = arith.index_cast %106 : i32 to index
      %108 = memref.load %arg2[%107] : memref<294xf32, #tpu.memory_space<smem>>
      %109 = vector.broadcast %108 : f32 to vector<1x8x16xf32>
      %110 = arith.mulf %105, %109 : vector<1x8x16xf32>
      %111 = arith.addf %103, %110 : vector<1x8x16xf32>
      %c0_85 = arith.constant 0 : index
      %112 = arith.index_cast %arg11 : i32 to index
      %c4 = arith.constant 4 : index
      %113 = vector.load %arg5[%c0_85, %112, %c4] : memref<1x14x22xf32, #tpu.memory_space<vmem>>, vector<1x8x16xf32>
      %c4_i32 = arith.constant 4 : i32
      %114 = arith.addi %79, %c4_i32 : i32
      %115 = arith.index_cast %114 : i32 to index
      %116 = memref.load %arg2[%115] : memref<294xf32, #tpu.memory_space<smem>>
      %117 = vector.broadcast %116 : f32 to vector<1x8x16xf32>
      %118 = arith.mulf %113, %117 : vector<1x8x16xf32>
      %119 = arith.addf %111, %118 : vector<1x8x16xf32>
      %c0_86 = arith.constant 0 : index
      %120 = arith.index_cast %arg11 : i32 to index
      %c5 = arith.constant 5 : index
      %121 = vector.load %arg5[%c0_86, %120, %c5] : memref<1x14x22xf32, #tpu.memory_space<vmem>>, vector<1x8x16xf32>
      %c5_i32 = arith.constant 5 : i32
      %122 = arith.addi %79, %c5_i32 : i32
      %123 = arith.index_cast %122 : i32 to index
      %124 = memref.load %arg2[%123] : memref<294xf32, #tpu.memory_space<smem>>
      %125 = vector.broadcast %124 : f32 to vector<1x8x16xf32>
      %126 = arith.mulf %121, %125 : vector<1x8x16xf32>
      %127 = arith.addf %119, %126 : vector<1x8x16xf32>
      %c0_87 = arith.constant 0 : index
      %128 = arith.index_cast %arg11 : i32 to index
      %c6 = arith.constant 6 : index
      %129 = vector.load %arg5[%c0_87, %128, %c6] : memref<1x14x22xf32, #tpu.memory_space<vmem>>, vector<1x8x16xf32>
      %c6_i32 = arith.constant 6 : i32
      %130 = arith.addi %79, %c6_i32 : i32
      %131 = arith.index_cast %130 : i32 to index
      %132 = memref.load %arg2[%131] : memref<294xf32, #tpu.memory_space<smem>>
      %133 = vector.broadcast %132 : f32 to vector<1x8x16xf32>
      %134 = arith.mulf %129, %133 : vector<1x8x16xf32>
      %135 = arith.addf %127, %134 : vector<1x8x16xf32>
      %c7_i32_88 = arith.constant 7 : i32
      %136 = arith.muli %arg11, %c7_i32_88 : i32
      %c49_i32 = arith.constant 49 : i32
      %137 = arith.addi %c49_i32, %136 : i32
      %c0_89 = arith.constant 0 : index
      %138 = arith.index_cast %arg11 : i32 to index
      %c0_90 = arith.constant 0 : index
      %139 = vector.load %arg6[%c0_89, %138, %c0_90] : memref<1x14x22xf32, #tpu.memory_space<vmem>>, vector<1x8x16xf32>
      %c0_i32_91 = arith.constant 0 : i32
      %140 = arith.addi %137, %c0_i32_91 : i32
      %141 = arith.index_cast %140 : i32 to index
      %142 = memref.load %arg2[%141] : memref<294xf32, #tpu.memory_space<smem>>
      %143 = vector.broadcast %142 : f32 to vector<1x8x16xf32>
      %144 = arith.mulf %139, %143 : vector<1x8x16xf32>
      %145 = arith.addf %135, %144 : vector<1x8x16xf32>
      %c0_92 = arith.constant 0 : index
      %146 = arith.index_cast %arg11 : i32 to index
      %c1_93 = arith.constant 1 : index
      %147 = vector.load %arg6[%c0_92, %146, %c1_93] : memref<1x14x22xf32, #tpu.memory_space<vmem>>, vector<1x8x16xf32>
      %c1_i32_94 = arith.constant 1 : i32
      %148 = arith.addi %137, %c1_i32_94 : i32
      %149 = arith.index_cast %148 : i32 to index
      %150 = memref.load %arg2[%149] : memref<294xf32, #tpu.memory_space<smem>>
      %151 = vector.broadcast %150 : f32 to vector<1x8x16xf32>
      %152 = arith.mulf %147, %151 : vector<1x8x16xf32>
      %153 = arith.addf %145, %152 : vector<1x8x16xf32>
      %c0_95 = arith.constant 0 : index
      %154 = arith.index_cast %arg11 : i32 to index
      %c2_96 = arith.constant 2 : index
      %155 = vector.load %arg6[%c0_95, %154, %c2_96] : memref<1x14x22xf32, #tpu.memory_space<vmem>>, vector<1x8x16xf32>
      %c2_i32_97 = arith.constant 2 : i32
      %156 = arith.addi %137, %c2_i32_97 : i32
      %157 = arith.index_cast %156 : i32 to index
      %158 = memref.load %arg2[%157] : memref<294xf32, #tpu.memory_space<smem>>
      %159 = vector.broadcast %158 : f32 to vector<1x8x16xf32>
      %160 = arith.mulf %155, %159 : vector<1x8x16xf32>
      %161 = arith.addf %153, %160 : vector<1x8x16xf32>
      %c0_98 = arith.constant 0 : index
      %162 = arith.index_cast %arg11 : i32 to index
      %c3_99 = arith.constant 3 : index
      %163 = vector.load %arg6[%c0_98, %162, %c3_99] : memref<1x14x22xf32, #tpu.memory_space<vmem>>, vector<1x8x16xf32>
      %c3_i32_100 = arith.constant 3 : i32
      %164 = arith.addi %137, %c3_i32_100 : i32
      %165 = arith.index_cast %164 : i32 to index
      %166 = memref.load %arg2[%165] : memref<294xf32, #tpu.memory_space<smem>>
      %167 = vector.broadcast %166 : f32 to vector<1x8x16xf32>
      %168 = arith.mulf %163, %167 : vector<1x8x16xf32>
      %169 = arith.addf %161, %168 : vector<1x8x16xf32>
      %c0_101 = arith.constant 0 : index
      %170 = arith.index_cast %arg11 : i32 to index
      %c4_102 = arith.constant 4 : index
      %171 = vector.load %arg6[%c0_101, %170, %c4_102] : memref<1x14x22xf32, #tpu.memory_space<vmem>>, vector<1x8x16xf32>
      %c4_i32_103 = arith.constant 4 : i32
      %172 = arith.addi %137, %c4_i32_103 : i32
      %173 = arith.index_cast %172 : i32 to index
      %174 = memref.load %arg2[%173] : memref<294xf32, #tpu.memory_space<smem>>
      %175 = vector.broadcast %174 : f32 to vector<1x8x16xf32>
      %176 = arith.mulf %171, %175 : vector<1x8x16xf32>
      %177 = arith.addf %169, %176 : vector<1x8x16xf32>
      %c0_104 = arith.constant 0 : index
      %178 = arith.index_cast %arg11 : i32 to index
      %c5_105 = arith.constant 5 : index
      %179 = vector.load %arg6[%c0_104, %178, %c5_105] : memref<1x14x22xf32, #tpu.memory_space<vmem>>, vector<1x8x16xf32>
      %c5_i32_106 = arith.constant 5 : i32
      %180 = arith.addi %137, %c5_i32_106 : i32
      %181 = arith.index_cast %180 : i32 to index
      %182 = memref.load %arg2[%181] : memref<294xf32, #tpu.memory_space<smem>>
      %183 = vector.broadcast %182 : f32 to vector<1x8x16xf32>
      %184 = arith.mulf %179, %183 : vector<1x8x16xf32>
      %185 = arith.addf %177, %184 : vector<1x8x16xf32>
      %c0_107 = arith.constant 0 : index
      %186 = arith.index_cast %arg11 : i32 to index
      %c6_108 = arith.constant 6 : index
      %187 = vector.load %arg6[%c0_107, %186, %c6_108] : memref<1x14x22xf32, #tpu.memory_space<vmem>>, vector<1x8x16xf32>
      %c6_i32_109 = arith.constant 6 : i32
      %188 = arith.addi %137, %c6_i32_109 : i32
      %189 = arith.index_cast %188 : i32 to index
      %190 = memref.load %arg2[%189] : memref<294xf32, #tpu.memory_space<smem>>
      %191 = vector.broadcast %190 : f32 to vector<1x8x16xf32>
      %192 = arith.mulf %187, %191 : vector<1x8x16xf32>
      %193 = arith.addf %185, %192 : vector<1x8x16xf32>
      scf.yield %193 : vector<1x8x16xf32>
    }
    %c7_i32_53 = arith.constant 7 : i32
    %c0_54 = arith.constant 0 : index
    %34 = memref.load %arg3[%c0_54] : memref<3xf32, #tpu.memory_space<smem>>
    %35 = vector.broadcast %34 : f32 to vector<1x8x16xf32>
    %36 = arith.addf %33, %35 : vector<1x8x16xf32>
    %37 = arith.negf %36 : vector<1x8x16xf32>
    %38 = math.exp %37 : vector<1x8x16xf32>
    %cst_55 = arith.constant 1.000000e+00 : f32
    %39 = vector.broadcast %cst_55 : f32 to vector<1x8x16xf32>
    %40 = arith.addf %39, %38 : vector<1x8x16xf32>
    %41 = arith.divf %39, %40 : vector<1x8x16xf32>
    %42 = arith.mulf %36, %41 : vector<1x8x16xf32>
    %cst_56 = arith.constant 0.000000e+00 : f32
    %43 = vector.broadcast %cst_56 : f32 to vector<1x8x16xf32>
    %c0_i32_57 = arith.constant 0 : i32
    %c7_i32_58 = arith.constant 7 : i32
    %44 = arith.addi %c0_i32_57, %c7_i32_58 : i32
    %c1_i32_59 = arith.constant 1 : i32
    %45 = scf.for %arg11 = %c0_i32_57 to %44 step %c1_i32_59 iter_args(%arg12 = %43) -> (vector<1x8x16xf32>)  : i32 {
      %c7_i32_73 = arith.constant 7 : i32
      %78 = arith.muli %arg11, %c7_i32_73 : i32
      %c98_i32 = arith.constant 98 : i32
      %79 = arith.addi %c98_i32, %78 : i32
      %c0_74 = arith.constant 0 : index
      %80 = arith.index_cast %arg11 : i32 to index
      %c0_75 = arith.constant 0 : index
      %81 = vector.load %arg7[%c0_74, %80, %c0_75] : memref<1x14x22xf32, #tpu.memory_space<vmem>>, vector<1x8x16xf32>
      %c0_i32_76 = arith.constant 0 : i32
      %82 = arith.addi %79, %c0_i32_76 : i32
      %83 = arith.index_cast %82 : i32 to index
      %84 = memref.load %arg2[%83] : memref<294xf32, #tpu.memory_space<smem>>
      %85 = vector.broadcast %84 : f32 to vector<1x8x16xf32>
      %86 = arith.mulf %81, %85 : vector<1x8x16xf32>
      %87 = arith.addf %arg12, %86 : vector<1x8x16xf32>
      %c0_77 = arith.constant 0 : index
      %88 = arith.index_cast %arg11 : i32 to index
      %c1_78 = arith.constant 1 : index
      %89 = vector.load %arg7[%c0_77, %88, %c1_78] : memref<1x14x22xf32, #tpu.memory_space<vmem>>, vector<1x8x16xf32>
      %c1_i32_79 = arith.constant 1 : i32
      %90 = arith.addi %79, %c1_i32_79 : i32
      %91 = arith.index_cast %90 : i32 to index
      %92 = memref.load %arg2[%91] : memref<294xf32, #tpu.memory_space<smem>>
      %93 = vector.broadcast %92 : f32 to vector<1x8x16xf32>
      %94 = arith.mulf %89, %93 : vector<1x8x16xf32>
      %95 = arith.addf %87, %94 : vector<1x8x16xf32>
      %c0_80 = arith.constant 0 : index
      %96 = arith.index_cast %arg11 : i32 to index
      %c2_81 = arith.constant 2 : index
      %97 = vector.load %arg7[%c0_80, %96, %c2_81] : memref<1x14x22xf32, #tpu.memory_space<vmem>>, vector<1x8x16xf32>
      %c2_i32 = arith.constant 2 : i32
      %98 = arith.addi %79, %c2_i32 : i32
      %99 = arith.index_cast %98 : i32 to index
      %100 = memref.load %arg2[%99] : memref<294xf32, #tpu.memory_space<smem>>
      %101 = vector.broadcast %100 : f32 to vector<1x8x16xf32>
      %102 = arith.mulf %97, %101 : vector<1x8x16xf32>
      %103 = arith.addf %95, %102 : vector<1x8x16xf32>
      %c0_82 = arith.constant 0 : index
      %104 = arith.index_cast %arg11 : i32 to index
      %c3_83 = arith.constant 3 : index
      %105 = vector.load %arg7[%c0_82, %104, %c3_83] : memref<1x14x22xf32, #tpu.memory_space<vmem>>, vector<1x8x16xf32>
      %c3_i32 = arith.constant 3 : i32
      %106 = arith.addi %79, %c3_i32 : i32
      %107 = arith.index_cast %106 : i32 to index
      %108 = memref.load %arg2[%107] : memref<294xf32, #tpu.memory_space<smem>>
      %109 = vector.broadcast %108 : f32 to vector<1x8x16xf32>
      %110 = arith.mulf %105, %109 : vector<1x8x16xf32>
      %111 = arith.addf %103, %110 : vector<1x8x16xf32>
      %c0_84 = arith.constant 0 : index
      %112 = arith.index_cast %arg11 : i32 to index
      %c4 = arith.constant 4 : index
      %113 = vector.load %arg7[%c0_84, %112, %c4] : memref<1x14x22xf32, #tpu.memory_space<vmem>>, vector<1x8x16xf32>
      %c4_i32 = arith.constant 4 : i32
      %114 = arith.addi %79, %c4_i32 : i32
      %115 = arith.index_cast %114 : i32 to index
      %116 = memref.load %arg2[%115] : memref<294xf32, #tpu.memory_space<smem>>
      %117 = vector.broadcast %116 : f32 to vector<1x8x16xf32>
      %118 = arith.mulf %113, %117 : vector<1x8x16xf32>
      %119 = arith.addf %111, %118 : vector<1x8x16xf32>
      %c0_85 = arith.constant 0 : index
      %120 = arith.index_cast %arg11 : i32 to index
      %c5 = arith.constant 5 : index
      %121 = vector.load %arg7[%c0_85, %120, %c5] : memref<1x14x22xf32, #tpu.memory_space<vmem>>, vector<1x8x16xf32>
      %c5_i32 = arith.constant 5 : i32
      %122 = arith.addi %79, %c5_i32 : i32
      %123 = arith.index_cast %122 : i32 to index
      %124 = memref.load %arg2[%123] : memref<294xf32, #tpu.memory_space<smem>>
      %125 = vector.broadcast %124 : f32 to vector<1x8x16xf32>
      %126 = arith.mulf %121, %125 : vector<1x8x16xf32>
      %127 = arith.addf %119, %126 : vector<1x8x16xf32>
      %c0_86 = arith.constant 0 : index
      %128 = arith.index_cast %arg11 : i32 to index
      %c6 = arith.constant 6 : index
      %129 = vector.load %arg7[%c0_86, %128, %c6] : memref<1x14x22xf32, #tpu.memory_space<vmem>>, vector<1x8x16xf32>
      %c6_i32 = arith.constant 6 : i32
      %130 = arith.addi %79, %c6_i32 : i32
      %131 = arith.index_cast %130 : i32 to index
      %132 = memref.load %arg2[%131] : memref<294xf32, #tpu.memory_space<smem>>
      %133 = vector.broadcast %132 : f32 to vector<1x8x16xf32>
      %134 = arith.mulf %129, %133 : vector<1x8x16xf32>
      %135 = arith.addf %127, %134 : vector<1x8x16xf32>
      %c7_i32_87 = arith.constant 7 : i32
      %136 = arith.muli %arg11, %c7_i32_87 : i32
      %c147_i32 = arith.constant 147 : i32
      %137 = arith.addi %c147_i32, %136 : i32
      %c0_88 = arith.constant 0 : index
      %138 = arith.index_cast %arg11 : i32 to index
      %c0_89 = arith.constant 0 : index
      %139 = vector.load %arg8[%c0_88, %138, %c0_89] : memref<1x14x22xf32, #tpu.memory_space<vmem>>, vector<1x8x16xf32>
      %c0_i32_90 = arith.constant 0 : i32
      %140 = arith.addi %137, %c0_i32_90 : i32
      %141 = arith.index_cast %140 : i32 to index
      %142 = memref.load %arg2[%141] : memref<294xf32, #tpu.memory_space<smem>>
      %143 = vector.broadcast %142 : f32 to vector<1x8x16xf32>
      %144 = arith.mulf %139, %143 : vector<1x8x16xf32>
      %145 = arith.addf %135, %144 : vector<1x8x16xf32>
      %c0_91 = arith.constant 0 : index
      %146 = arith.index_cast %arg11 : i32 to index
      %c1_92 = arith.constant 1 : index
      %147 = vector.load %arg8[%c0_91, %146, %c1_92] : memref<1x14x22xf32, #tpu.memory_space<vmem>>, vector<1x8x16xf32>
      %c1_i32_93 = arith.constant 1 : i32
      %148 = arith.addi %137, %c1_i32_93 : i32
      %149 = arith.index_cast %148 : i32 to index
      %150 = memref.load %arg2[%149] : memref<294xf32, #tpu.memory_space<smem>>
      %151 = vector.broadcast %150 : f32 to vector<1x8x16xf32>
      %152 = arith.mulf %147, %151 : vector<1x8x16xf32>
      %153 = arith.addf %145, %152 : vector<1x8x16xf32>
      %c0_94 = arith.constant 0 : index
      %154 = arith.index_cast %arg11 : i32 to index
      %c2_95 = arith.constant 2 : index
      %155 = vector.load %arg8[%c0_94, %154, %c2_95] : memref<1x14x22xf32, #tpu.memory_space<vmem>>, vector<1x8x16xf32>
      %c2_i32_96 = arith.constant 2 : i32
      %156 = arith.addi %137, %c2_i32_96 : i32
      %157 = arith.index_cast %156 : i32 to index
      %158 = memref.load %arg2[%157] : memref<294xf32, #tpu.memory_space<smem>>
      %159 = vector.broadcast %158 : f32 to vector<1x8x16xf32>
      %160 = arith.mulf %155, %159 : vector<1x8x16xf32>
      %161 = arith.addf %153, %160 : vector<1x8x16xf32>
      %c0_97 = arith.constant 0 : index
      %162 = arith.index_cast %arg11 : i32 to index
      %c3_98 = arith.constant 3 : index
      %163 = vector.load %arg8[%c0_97, %162, %c3_98] : memref<1x14x22xf32, #tpu.memory_space<vmem>>, vector<1x8x16xf32>
      %c3_i32_99 = arith.constant 3 : i32
      %164 = arith.addi %137, %c3_i32_99 : i32
      %165 = arith.index_cast %164 : i32 to index
      %166 = memref.load %arg2[%165] : memref<294xf32, #tpu.memory_space<smem>>
      %167 = vector.broadcast %166 : f32 to vector<1x8x16xf32>
      %168 = arith.mulf %163, %167 : vector<1x8x16xf32>
      %169 = arith.addf %161, %168 : vector<1x8x16xf32>
      %c0_100 = arith.constant 0 : index
      %170 = arith.index_cast %arg11 : i32 to index
      %c4_101 = arith.constant 4 : index
      %171 = vector.load %arg8[%c0_100, %170, %c4_101] : memref<1x14x22xf32, #tpu.memory_space<vmem>>, vector<1x8x16xf32>
      %c4_i32_102 = arith.constant 4 : i32
      %172 = arith.addi %137, %c4_i32_102 : i32
      %173 = arith.index_cast %172 : i32 to index
      %174 = memref.load %arg2[%173] : memref<294xf32, #tpu.memory_space<smem>>
      %175 = vector.broadcast %174 : f32 to vector<1x8x16xf32>
      %176 = arith.mulf %171, %175 : vector<1x8x16xf32>
      %177 = arith.addf %169, %176 : vector<1x8x16xf32>
      %c0_103 = arith.constant 0 : index
      %178 = arith.index_cast %arg11 : i32 to index
      %c5_104 = arith.constant 5 : index
      %179 = vector.load %arg8[%c0_103, %178, %c5_104] : memref<1x14x22xf32, #tpu.memory_space<vmem>>, vector<1x8x16xf32>
      %c5_i32_105 = arith.constant 5 : i32
      %180 = arith.addi %137, %c5_i32_105 : i32
      %181 = arith.index_cast %180 : i32 to index
      %182 = memref.load %arg2[%181] : memref<294xf32, #tpu.memory_space<smem>>
      %183 = vector.broadcast %182 : f32 to vector<1x8x16xf32>
      %184 = arith.mulf %179, %183 : vector<1x8x16xf32>
      %185 = arith.addf %177, %184 : vector<1x8x16xf32>
      %c0_106 = arith.constant 0 : index
      %186 = arith.index_cast %arg11 : i32 to index
      %c6_107 = arith.constant 6 : index
      %187 = vector.load %arg8[%c0_106, %186, %c6_107] : memref<1x14x22xf32, #tpu.memory_space<vmem>>, vector<1x8x16xf32>
      %c6_i32_108 = arith.constant 6 : i32
      %188 = arith.addi %137, %c6_i32_108 : i32
      %189 = arith.index_cast %188 : i32 to index
      %190 = memref.load %arg2[%189] : memref<294xf32, #tpu.memory_space<smem>>
      %191 = vector.broadcast %190 : f32 to vector<1x8x16xf32>
      %192 = arith.mulf %187, %191 : vector<1x8x16xf32>
      %193 = arith.addf %185, %192 : vector<1x8x16xf32>
      scf.yield %193 : vector<1x8x16xf32>
    }
    %c7_i32_60 = arith.constant 7 : i32
    %c1 = arith.constant 1 : index
    %46 = memref.load %arg3[%c1] : memref<3xf32, #tpu.memory_space<smem>>
    %47 = vector.broadcast %46 : f32 to vector<1x8x16xf32>
    %48 = arith.addf %45, %47 : vector<1x8x16xf32>
    %49 = arith.negf %48 : vector<1x8x16xf32>
    %50 = math.exp %49 : vector<1x8x16xf32>
    %cst_61 = arith.constant 1.000000e+00 : f32
    %51 = vector.broadcast %cst_61 : f32 to vector<1x8x16xf32>
    %52 = arith.addf %51, %50 : vector<1x8x16xf32>
    %53 = arith.divf %51, %52 : vector<1x8x16xf32>
    %54 = arith.mulf %48, %53 : vector<1x8x16xf32>
    %cst_62 = arith.constant 0.000000e+00 : f32
    %55 = vector.broadcast %cst_62 : f32 to vector<1x16x16xf32>
    %c0_i32_63 = arith.constant 0 : i32
    %c7_i32_64 = arith.constant 7 : i32
    %56 = arith.addi %c0_i32_63, %c7_i32_64 : i32
    %c1_i32_65 = arith.constant 1 : i32
    %57 = scf.for %arg11 = %c0_i32_63 to %56 step %c1_i32_65 iter_args(%arg12 = %55) -> (vector<1x16x16xf32>)  : i32 {
      %c7_i32_73 = arith.constant 7 : i32
      %78 = arith.muli %arg11, %c7_i32_73 : i32
      %c196_i32 = arith.constant 196 : i32
      %79 = arith.addi %c196_i32, %78 : i32
      %c0_74 = arith.constant 0 : index
      %80 = arith.index_cast %arg11 : i32 to index
      %c0_75 = arith.constant 0 : index
      %81 = vector.load %arg9[%c0_74, %80, %c0_75] : memref<1x22x22xf32, #tpu.memory_space<vmem>>, vector<1x16x16xf32>
      %c0_i32_76 = arith.constant 0 : i32
      %82 = arith.addi %79, %c0_i32_76 : i32
      %83 = arith.index_cast %82 : i32 to index
      %84 = memref.load %arg2[%83] : memref<294xf32, #tpu.memory_space<smem>>
      %85 = vector.broadcast %84 : f32 to vector<1x16x16xf32>
      %86 = arith.mulf %81, %85 : vector<1x16x16xf32>
      %87 = arith.addf %arg12, %86 : vector<1x16x16xf32>
      %c0_77 = arith.constant 0 : index
      %88 = arith.index_cast %arg11 : i32 to index
      %c1_78 = arith.constant 1 : index
      %89 = vector.load %arg9[%c0_77, %88, %c1_78] : memref<1x22x22xf32, #tpu.memory_space<vmem>>, vector<1x16x16xf32>
      %c1_i32_79 = arith.constant 1 : i32
      %90 = arith.addi %79, %c1_i32_79 : i32
      %91 = arith.index_cast %90 : i32 to index
      %92 = memref.load %arg2[%91] : memref<294xf32, #tpu.memory_space<smem>>
      %93 = vector.broadcast %92 : f32 to vector<1x16x16xf32>
      %94 = arith.mulf %89, %93 : vector<1x16x16xf32>
      %95 = arith.addf %87, %94 : vector<1x16x16xf32>
      %c0_80 = arith.constant 0 : index
      %96 = arith.index_cast %arg11 : i32 to index
      %c2_81 = arith.constant 2 : index
      %97 = vector.load %arg9[%c0_80, %96, %c2_81] : memref<1x22x22xf32, #tpu.memory_space<vmem>>, vector<1x16x16xf32>
      %c2_i32 = arith.constant 2 : i32
      %98 = arith.addi %79, %c2_i32 : i32
      %99 = arith.index_cast %98 : i32 to index
      %100 = memref.load %arg2[%99] : memref<294xf32, #tpu.memory_space<smem>>
      %101 = vector.broadcast %100 : f32 to vector<1x16x16xf32>
      %102 = arith.mulf %97, %101 : vector<1x16x16xf32>
      %103 = arith.addf %95, %102 : vector<1x16x16xf32>
      %c0_82 = arith.constant 0 : index
      %104 = arith.index_cast %arg11 : i32 to index
      %c3_83 = arith.constant 3 : index
      %105 = vector.load %arg9[%c0_82, %104, %c3_83] : memref<1x22x22xf32, #tpu.memory_space<vmem>>, vector<1x16x16xf32>
      %c3_i32 = arith.constant 3 : i32
      %106 = arith.addi %79, %c3_i32 : i32
      %107 = arith.index_cast %106 : i32 to index
      %108 = memref.load %arg2[%107] : memref<294xf32, #tpu.memory_space<smem>>
      %109 = vector.broadcast %108 : f32 to vector<1x16x16xf32>
      %110 = arith.mulf %105, %109 : vector<1x16x16xf32>
      %111 = arith.addf %103, %110 : vector<1x16x16xf32>
      %c0_84 = arith.constant 0 : index
      %112 = arith.index_cast %arg11 : i32 to index
      %c4 = arith.constant 4 : index
      %113 = vector.load %arg9[%c0_84, %112, %c4] : memref<1x22x22xf32, #tpu.memory_space<vmem>>, vector<1x16x16xf32>
      %c4_i32 = arith.constant 4 : i32
      %114 = arith.addi %79, %c4_i32 : i32
      %115 = arith.index_cast %114 : i32 to index
      %116 = memref.load %arg2[%115] : memref<294xf32, #tpu.memory_space<smem>>
      %117 = vector.broadcast %116 : f32 to vector<1x16x16xf32>
      %118 = arith.mulf %113, %117 : vector<1x16x16xf32>
      %119 = arith.addf %111, %118 : vector<1x16x16xf32>
      %c0_85 = arith.constant 0 : index
      %120 = arith.index_cast %arg11 : i32 to index
      %c5 = arith.constant 5 : index
      %121 = vector.load %arg9[%c0_85, %120, %c5] : memref<1x22x22xf32, #tpu.memory_space<vmem>>, vector<1x16x16xf32>
      %c5_i32 = arith.constant 5 : i32
      %122 = arith.addi %79, %c5_i32 : i32
      %123 = arith.index_cast %122 : i32 to index
      %124 = memref.load %arg2[%123] : memref<294xf32, #tpu.memory_space<smem>>
      %125 = vector.broadcast %124 : f32 to vector<1x16x16xf32>
      %126 = arith.mulf %121, %125 : vector<1x16x16xf32>
      %127 = arith.addf %119, %126 : vector<1x16x16xf32>
      %c0_86 = arith.constant 0 : index
      %128 = arith.index_cast %arg11 : i32 to index
      %c6 = arith.constant 6 : index
      %129 = vector.load %arg9[%c0_86, %128, %c6] : memref<1x22x22xf32, #tpu.memory_space<vmem>>, vector<1x16x16xf32>
      %c6_i32 = arith.constant 6 : i32
      %130 = arith.addi %79, %c6_i32 : i32
      %131 = arith.index_cast %130 : i32 to index
      %132 = memref.load %arg2[%131] : memref<294xf32, #tpu.memory_space<smem>>
      %133 = vector.broadcast %132 : f32 to vector<1x16x16xf32>
      %134 = arith.mulf %129, %133 : vector<1x16x16xf32>
      %135 = arith.addf %127, %134 : vector<1x16x16xf32>
      %c7_i32_87 = arith.constant 7 : i32
      %136 = arith.muli %arg11, %c7_i32_87 : i32
      %c245_i32 = arith.constant 245 : i32
      %137 = arith.addi %c245_i32, %136 : i32
      %c0_88 = arith.constant 0 : index
      %138 = arith.index_cast %arg11 : i32 to index
      %c0_89 = arith.constant 0 : index
      %139 = vector.load %arg10[%c0_88, %138, %c0_89] : memref<1x22x22xf32, #tpu.memory_space<vmem>>, vector<1x16x16xf32>
      %c0_i32_90 = arith.constant 0 : i32
      %140 = arith.addi %137, %c0_i32_90 : i32
      %141 = arith.index_cast %140 : i32 to index
      %142 = memref.load %arg2[%141] : memref<294xf32, #tpu.memory_space<smem>>
      %143 = vector.broadcast %142 : f32 to vector<1x16x16xf32>
      %144 = arith.mulf %139, %143 : vector<1x16x16xf32>
      %145 = arith.addf %135, %144 : vector<1x16x16xf32>
      %c0_91 = arith.constant 0 : index
      %146 = arith.index_cast %arg11 : i32 to index
      %c1_92 = arith.constant 1 : index
      %147 = vector.load %arg10[%c0_91, %146, %c1_92] : memref<1x22x22xf32, #tpu.memory_space<vmem>>, vector<1x16x16xf32>
      %c1_i32_93 = arith.constant 1 : i32
      %148 = arith.addi %137, %c1_i32_93 : i32
      %149 = arith.index_cast %148 : i32 to index
      %150 = memref.load %arg2[%149] : memref<294xf32, #tpu.memory_space<smem>>
      %151 = vector.broadcast %150 : f32 to vector<1x16x16xf32>
      %152 = arith.mulf %147, %151 : vector<1x16x16xf32>
      %153 = arith.addf %145, %152 : vector<1x16x16xf32>
      %c0_94 = arith.constant 0 : index
      %154 = arith.index_cast %arg11 : i32 to index
      %c2_95 = arith.constant 2 : index
      %155 = vector.load %arg10[%c0_94, %154, %c2_95] : memref<1x22x22xf32, #tpu.memory_space<vmem>>, vector<1x16x16xf32>
      %c2_i32_96 = arith.constant 2 : i32
      %156 = arith.addi %137, %c2_i32_96 : i32
      %157 = arith.index_cast %156 : i32 to index
      %158 = memref.load %arg2[%157] : memref<294xf32, #tpu.memory_space<smem>>
      %159 = vector.broadcast %158 : f32 to vector<1x16x16xf32>
      %160 = arith.mulf %155, %159 : vector<1x16x16xf32>
      %161 = arith.addf %153, %160 : vector<1x16x16xf32>
      %c0_97 = arith.constant 0 : index
      %162 = arith.index_cast %arg11 : i32 to index
      %c3_98 = arith.constant 3 : index
      %163 = vector.load %arg10[%c0_97, %162, %c3_98] : memref<1x22x22xf32, #tpu.memory_space<vmem>>, vector<1x16x16xf32>
      %c3_i32_99 = arith.constant 3 : i32
      %164 = arith.addi %137, %c3_i32_99 : i32
      %165 = arith.index_cast %164 : i32 to index
      %166 = memref.load %arg2[%165] : memref<294xf32, #tpu.memory_space<smem>>
      %167 = vector.broadcast %166 : f32 to vector<1x16x16xf32>
      %168 = arith.mulf %163, %167 : vector<1x16x16xf32>
      %169 = arith.addf %161, %168 : vector<1x16x16xf32>
      %c0_100 = arith.constant 0 : index
      %170 = arith.index_cast %arg11 : i32 to index
      %c4_101 = arith.constant 4 : index
      %171 = vector.load %arg10[%c0_100, %170, %c4_101] : memref<1x22x22xf32, #tpu.memory_space<vmem>>, vector<1x16x16xf32>
      %c4_i32_102 = arith.constant 4 : i32
      %172 = arith.addi %137, %c4_i32_102 : i32
      %173 = arith.index_cast %172 : i32 to index
      %174 = memref.load %arg2[%173] : memref<294xf32, #tpu.memory_space<smem>>
      %175 = vector.broadcast %174 : f32 to vector<1x16x16xf32>
      %176 = arith.mulf %171, %175 : vector<1x16x16xf32>
      %177 = arith.addf %169, %176 : vector<1x16x16xf32>
      %c0_103 = arith.constant 0 : index
      %178 = arith.index_cast %arg11 : i32 to index
      %c5_104 = arith.constant 5 : index
      %179 = vector.load %arg10[%c0_103, %178, %c5_104] : memref<1x22x22xf32, #tpu.memory_space<vmem>>, vector<1x16x16xf32>
      %c5_i32_105 = arith.constant 5 : i32
      %180 = arith.addi %137, %c5_i32_105 : i32
      %181 = arith.index_cast %180 : i32 to index
      %182 = memref.load %arg2[%181] : memref<294xf32, #tpu.memory_space<smem>>
      %183 = vector.broadcast %182 : f32 to vector<1x16x16xf32>
      %184 = arith.mulf %179, %183 : vector<1x16x16xf32>
      %185 = arith.addf %177, %184 : vector<1x16x16xf32>
      %c0_106 = arith.constant 0 : index
      %186 = arith.index_cast %arg11 : i32 to index
      %c6_107 = arith.constant 6 : index
      %187 = vector.load %arg10[%c0_106, %186, %c6_107] : memref<1x22x22xf32, #tpu.memory_space<vmem>>, vector<1x16x16xf32>
      %c6_i32_108 = arith.constant 6 : i32
      %188 = arith.addi %137, %c6_i32_108 : i32
      %189 = arith.index_cast %188 : i32 to index
      %190 = memref.load %arg2[%189] : memref<294xf32, #tpu.memory_space<smem>>
      %191 = vector.broadcast %190 : f32 to vector<1x16x16xf32>
      %192 = arith.mulf %187, %191 : vector<1x16x16xf32>
      %193 = arith.addf %185, %192 : vector<1x16x16xf32>
      scf.yield %193 : vector<1x16x16xf32>
    }
    %c7_i32_66 = arith.constant 7 : i32
    %c2 = arith.constant 2 : index
    %58 = memref.load %arg3[%c2] : memref<3xf32, #tpu.memory_space<smem>>
    %59 = vector.broadcast %58 : f32 to vector<1x16x16xf32>
    %60 = arith.addf %57, %59 : vector<1x16x16xf32>
    %61 = arith.negf %60 : vector<1x16x16xf32>
    %62 = math.exp %61 : vector<1x16x16xf32>
    %cst_67 = arith.constant 1.000000e+00 : f32
    %63 = vector.broadcast %cst_67 : f32 to vector<1x16x16xf32>
    %64 = arith.addf %63, %62 : vector<1x16x16xf32>
    %65 = arith.divf %63, %64 : vector<1x16x16xf32>
    %66 = arith.mulf %60, %65 : vector<1x16x16xf32>
    %67 = vector.shape_cast %42 : vector<1x8x16xf32> to vector<1x8x1x16xf32>
    %68 = vector.shape_cast %54 : vector<1x8x16xf32> to vector<1x8x16x1xf32>
    %69 = vector.broadcast %67 : vector<1x8x1x16xf32> to vector<1x8x16x16xf32>
    %70 = vector.broadcast %68 : vector<1x8x16x1xf32> to vector<1x8x16x16xf32>
    %71 = arith.addf %69, %70 : vector<1x8x16x16xf32>
    %72 = vector.shape_cast %66 : vector<1x16x16xf32> to vector<1x1x16x16xf32>
    %73 = vector.broadcast %72 : vector<1x1x16x16xf32> to vector<1x8x16x16xf32>
    %74 = arith.addf %71, %73 : vector<1x8x16x16xf32>
    %cst_68 = arith.constant 0.333333343 : f32
    %75 = vector.broadcast %cst_68 : f32 to vector<1x8x16x16xf32>
    %76 = arith.mulf %74, %75 : vector<1x8x16x16xf32>
    %c0_69 = arith.constant 0 : index
    %c0_70 = arith.constant 0 : index
    %c0_71 = arith.constant 0 : index
    %c0_72 = arith.constant 0 : index
    %77 = vector.load %arg4[%c0_69, %c0_70, %c0_71, %c0_72] : memref<1x8x16x16xf32, #tpu.memory_space<vmem>>, vector<1x8x16x16xf32>
    tpu.vector_store %arg4[%c0_69, %c0_70, %c0_71, %c0_72], %76 {strides = array<i32>} : memref<1x8x16x16xf32, #tpu.memory_space<vmem>>, vector<1x8x16x16xf32>,
    return
  }
  func.func @transform_0(%arg0: i32) -> (i32, i32, i32, i32) {
    %c0_i32 = arith.constant 0 : i32
    %c0_i32_0 = arith.constant 0 : i32
    %c0_i32_1 = arith.constant 0 : i32
    %c0_i32_2 = arith.constant 0 : i32
    return %arg0, %c0_i32, %c0_i32_0, %c0_i32_1 : i32, i32, i32, i32
  }
  func.func @transform_1(%arg0: i32) -> i32 {
    %c0_i32 = arith.constant 0 : i32
    %c0_i32_0 = arith.constant 0 : i32
    return %c0_i32 : i32
  }
  func.func @transform_2(%arg0: i32) -> i32 {
    %c0_i32 = arith.constant 0 : i32
    %c0_i32_0 = arith.constant 0 : i32
    return %c0_i32 : i32
  }
  func.func @transform_3(%arg0: i32) -> (i32, i32, i32, i32) {
    %c0_i32 = arith.constant 0 : i32
    %c0_i32_0 = arith.constant 0 : i32
    %c0_i32_1 = arith.constant 0 : i32
    %c0_i32_2 = arith.constant 0 : i32
    return %arg0, %c0_i32, %c0_i32_0, %c0_i32_1 : i32, i32, i32, i32
  }
}

</mosaic_0001>

<bundles_post_ra>
// kernel: tpu_custom_call.1
= control target key start
LH: loop header
LB: loop body
LE: loop exit
PB: predicated region body
PF: predicated region fallthrough
CT: control target
= control target key end

     0   :  { %s2934_s0 = inlined_call_operand.hbm [shape: f32[2,8,16,16], index: 0, kind: input, shape index: {}]   ;;  %s2935_s1 = inlined_call_operand.hbm [shape: f32[294], index: 1, kind: input, shape index: {}]   ;;  %s2936_s2 = inlined_call_operand.vmem [shape: f32[3], index: 2, kind: input, shape index: {}]   ;;  %s2937_s3 = inlined_call_operand.hbm [shape: f32[2,8,16,16], index: 3, kind: output, shape index: {}]  }
   0x1   :  { %2949 = sst [smem:[#allocation22_spill]] %s2934_s0 }
   0x2   :  { %2950 = sst [smem:[#allocation23_spill]] %s2935_s1 }
   0x3   :  { %8 = vsyncpa [#allocation9], 0 }
   0x4   :  { %10 = vsyncpa [#allocation9 + $0x1], 0 }
   0x5   :  { %11 = vsyncpa [#allocation11], 0 }
   0x6   :  { %12 = vsyncpa [#allocation12], 0 }
   0x7   :  { %13 = vsyncpa [#allocation10], 0 }
   0x8   :  { %15 = vsyncpa [#allocation10 + $0x1], 0  ;;  %s2095_s12 = smov 0   ;;  %s2097_s13 = smov 0  }
   0x9   :  { %s2099_s14 = smov 0   ;;  %s2101_s15 = smov 0  }
   0xa LB: > { %s2116_s16 = sadd.s32 4294967295, %s2016_s15   ;;  %s1666_s17 = sadd.s32 4294967294, %s2016_s15   ;;  %s2016_s15 = sphi %s2101_s15, %s2986_s15   ;;  %s2012_s14 = sphi %s2099_s14, %s2985_s14   ;;  %s2008_s13 = sphi %s2097_s13, %s2984_s13   ;;  %s2004_s12 = sphi %s2095_s12, %s2983_s12  }
   0xb   : > { %s2120_s18 = sadd.s32 1, %s2016_s15   ;;  %s28_s19 = sadd.s32 1, %s2012_s14 }
   0xc   : > { %s25_s20 = ssub.s32 %s2016_s15, %s2120_s18  ;;  %p35_p0 = scmp.ne.s32.totalorder %s2012_s14, %s2008_s13 }
   0xd   : > { %p26_p1 = scmp.eq.s32.totalorder %s25_s20, 0  ;;  %p36_p2 = scmp.eq.s32.totalorder %s2016_s15, 0 }
   0xe   : > { %p41_p3 = scmp.ne.s32.totalorder %s2008_s13, %s2004_s12  ;;  %p2938_p4 = scmp.eq.s32.totalorder %s2116_s16, 0 }
   0xf   : > { %s2132_s21 = scalar_select %p26_p1, %s2012_s14, %s28_s19  }
  0x10   : > { %p2134_p5 = por %p36_p2, %p35_p0  ;;  %p2140_p6 = por %p2938_p4, %p41_p3 }
  0x11   : > { %p107_p7 = scmp.eq.s32.totalorder %s2116_s16, 1  ;;  %p113_p8 = scmp.eq.s32.totalorder %s1666_s17, 1 }
  0x12   : > { %s2952_s23 = scalar_select %p2140_p6, 1, 0 }
  0x13   : > { %p1667_p9 = scmp.ge.s32.totalorder %s2016_s15, 1  ;;  %p120_p10 = scmp.lt.s32.totalorder %s2016_s15, 3 }
  0x14   : > { %p2147_p11 = por %p107_p7, %p35_p0  ;;  %p2151_p12 = por %p113_p8, %p41_p3 }
  0x15   : > { %p2155_p13 = pnand %p1667_p9, %p120_p10  ;;  %p1721_p4 = scmp.lt.s32.totalorder %s2016_s15, 2 }
  0x16   : > { %s2953_s24 = scalar_select %p2147_p11, 1, 0 }
  0x17   : > { %s2954_s25 = scalar_select %p2151_p12, 1, 0 }
  0x18   : > { %s2955_s26 = scalar_select %p2155_p13, 1, 0 }
  0x19   : > { %p1704_p2 = pneg %p2155_p13  ;;  %s142_s29 = sshll.u32 %s2936_s2, 4  ;;  %s143_s29 = int_to_ptr.vmem [resolvable:$true] %s142_s29 }
  0x1a   : > { %p2956_p0 = scmp.eq.s32.totalorder %s2116_s16, 0  ;;  %p2174_p3 = pnand %p1721_p4, %p2134_p5 }
  0x1b   : > { %s153_s5 = sand.u32 1, %s2012_s14   ;;  %s2959_s1 = sld [smem:[#allocation23_spill]] }
  0x1c   : > { %p2168_p7 = pnand %p1704_p2, %p2956_p0 }
  0x1e   : > { %p1858_p9 = pneg %p2168_p7 }
  0x21   : > { %s1856_s8 = scalar_lea.hbm %s2959_s1, 48  ;;  %s1861_s19 = scalar_lea.hbm %s2959_s1, 64 }
  0x22   : > { %p1857_p8 = scmp.ne.s32.totalorder %s2959_s1, %s1856_s8  ;;  %p1862_p4 = scmp.lt.u32.totalorder %s1861_s19, %s1856_s8 }
  0x23   : > { %p1863_p5 = scmp.lt.u32.totalorder %s1856_s8, %s2959_s1 }
  0x24   : > { %p1859_p10 = pnand %p1858_p9, %p1857_p8 }
  0x25   : > { %p1864_p0 = por %p1863_p5, %p1862_p4 }
  0x26   : > { %p1860_p2 = pneg %p1859_p10 }
  0x28   : > { %p1865_p1 = pnand %p1864_p0, %p1860_p2 }
  0x2a   : > { %1868 = shalt.err (!%p1865_p1)
}
  0x2b   : > { %s2046_s27 = smov [#allocation13]   ;;  %s1869_s7 = scalar_lea.vmem %s143_s29, 16 }
  0x2c   : > { %1707 = dma.hbm_to_smem (!%p2168_p7), %s2959_s1, 48, %s2046_s27, [#allocation11]  }
  0x2d   : > { %p1870_p8 = scmp.ne.s32.totalorder %s143_s29, %s1869_s7  ;;  %p1877_p11 = scmp.lt.s32.totalorder %s143_s29, %s143_s29 }
  0x2e   : > { %p1878_p6 = scmp.lt.s32.totalorder %s1869_s7, %s1869_s7 }
  0x2f   : > { %p1872_p10 = pnand %p1870_p8, %p1858_p9 }
  0x30   : > { %p1879_p13 = por %p1878_p6, %p1877_p11 }
  0x31   : > { %p1873_p12 = pneg %p1872_p10 }
  0x33   : > { %p1880_p4 = pnand %p1879_p13, %p1873_p12 }
  0x35   : > { %1883 = shalt.err (!%p1880_p4)
}
  0x36   : > { %s2047_s8 = smov [#allocation14]   ;;  %s1671_s9 = sshll.u32 %s153_s5, 7 }
  0x37   : > { %1710 = dma.vmem_to_smem (!%p2168_p7), %s143_s29, 16, %s2047_s8, [#allocation12]  }
  0x38   : > { %s1690_s10 = sshll.u32 %s2016_s15, 11  ;;  %s2960_s0 = sld [smem:[#allocation22_spill]] }
  0x39   : > { %s157_s20 = scalar_lea.vmem [#allocation8], %s1671_s9  ;;  %s2218_s22 = scalar_lea.sflag [#allocation9], %s153_s5 }
  0x3a   : > { %s164_s30 = sshll.u32 %s157_s20, 4  ;;  %p1886_p11 = pneg %p2174_p3  ;;  %s2214_s30 = int_to_ptr.vmem [resolvable:$true] %s164_s30 }
  0x3e   : > { %s2212_s19 = scalar_lea.hbm %s2960_s0, %s1690_s10  ;;  %s1889_s6 = scalar_lea.hbm %s2960_s0, 4096 }
  0x3f   : > { %s1884_s29 = scalar_lea.hbm %s2212_s19, 2048  ;;  %p1890_p1 = scmp.lt.u32.totalorder %s2212_s19, %s2960_s0 }
  0x40   : > { %p1885_p6 = scmp.ne.s32.totalorder %s2212_s19, %s1884_s29  ;;  %p1891_p7 = scmp.lt.u32.totalorder %s1889_s6, %s1884_s29 }
  0x41   : > { %p1893_p2 = scmp.lt.u32.totalorder %s1884_s29, %s2212_s19 }
  0x42   : > { %p1887_p12 = pnand %p1886_p11, %p1885_p6  ;;  %p1892_p9 = por %p1891_p7, %p1890_p1 }
  0x44   : > { %p1888_p13 = pneg %p1887_p12  ;;  %p1894_p5 = por %p1893_p2, %p1892_p9 }
  0x46   : > { %p1895_p0 = pnand %p1894_p5, %p1888_p13 }
  0x48   : > { %1898 = shalt.err (!%p1895_p0)
}
  0x49   : > { %s1899_s5 = scalar_lea.vmem %s2214_s30, 2048  ;;  %s2048_s9 = smov [#allocation8]  }
  0x4a   : > { %p1900_p8 = scmp.ne.s32.totalorder %s2214_s30, %s1899_s5  ;;  %s1904_s10 = sshll.u32 %s2048_s9, 4  ;;  %s1905_s10 = int_to_ptr.vmem [resolvable:$false] %s1904_s10 }
  0x4b   : > { %s1906_s11 = scalar_lea.vmem %s1905_s10, 4096  ;;  %p1907_p6 = scmp.lt.s32.totalorder %s2214_s30, %s1905_s10 }
  0x4c   : > { %p1902_p10 = pnand %p1900_p8, %p1886_p11  ;;  %p1908_p12 = scmp.lt.s32.totalorder %s1906_s11, %s1899_s5 }
  0x4e   : > { %p1903_p4 = pneg %p1902_p10  ;;  %p1909_p1 = por %p1908_p12, %p1907_p6 }
  0x50   : > { %p1910_p7 = pnand %p1909_p1, %p1903_p4 }
  0x52   : > { %1913 = shalt.err (!%p1910_p7)
}
  0x53   : > { %s2049_s17 = smov 128   ;;  %s2050_s20 = smov 8  }
  0x54   : > { %1714 = dma.hbm_to_vmem [thread:$0]  (!%p2174_p3), %s2212_s19, 2048, %s2214_s30, %s2218_s22, %s2049_s17, %s2049_s17, %s2050_s20  }
  0x55   : > { %p2961_p11 = scmp.ne.s32.totalorder %s2955_s26, 0 }
  0x57   : > { %176 = sbr.rel (%p2961_p11) target bundleno = 976 (0x3d0), region = 32 }
  0x5e   : > { %s2249_s29 = sand.u32 1, %s2008_s13   ;;  %p2962_p13 = scmp.ne.s32.totalorder %s2952_s23, 0 }
  0x5f   : > { %s1675_s27 = sshll.u32 %s2249_s29, 7  ;;  %s179_s28 = scalar_lea.sflag [#allocation9], %s2249_s29 }
  0x60   : > { %s2255_s6 = scalar_lea.vmem [#allocation8], %s1675_s27 }
  0x61   : > { %1987 = dma.done.wait (%p2962_p13), %s179_s28, 2048  }
  0x62   : > { %1989 = vsyncadd (%p2962_p13), %s179_s28, 4294965248  ;;  %p2963_p3 = scmp.eq.s32.totalorder %s2116_s16, 0 }
  0x64   : > { %1991 = dma.done.wait (%p2963_p3), [#allocation11], 48   ;;  %p2964_p9 = pmov %p2963_p3 }
  0x65   : > { %p2965_p2 = pmov %p2963_p3 }
  0x66   : > { %1993 = vsyncadd (%p2964_p9), [#allocation11], 4294967248 }
  0x67   : > { %1995 = dma.done.wait (%p2965_p2), [#allocation12], 16   ;;  %p2966_p5 = pmov %p2965_p2 }
  0x69   : > { %1997 = vsyncadd (%p2966_p5), [#allocation12], 4294967280 }
  0x6a   : > { %195 = sfence }
  0x6b   : > { %v216_v0 = vld [vmem:[%s2255_s6 + $0x10] sm:$0xff]  ;;  %vm230_vm0 = vcmask 130048   ;;  %v214_v1 = vld [vmem:[%s2255_s6] sm:$0xff]  ;;  %v217_v2 = vld [vmem:[%s2255_s6 + $0x18] sm:$0xff]  ;;  %vm517_vm1 = vcmask 1041409   ;;  %vm519_vm2 = vcmask 1042434  }
  0x6c   : > { %v312_v3 = vsel %vm230_vm0, %v216_v0, 0.0  ;;  %v303_v4 = vsel %vm230_vm0, %v214_v1, 0.0  ;;  %v215_v5 = vld [vmem:[%s2255_s6 + $0x8] sm:$0xff]  ;;  %v218_v7 = vld [vmem:[%s2255_s6 + $0x20] sm:$0xff]  ;;  %v313_v9 = vsel %vm230_vm0, %v217_v2, 0.0  ;;  %v2289_v17 = vsel %vm230_vm0, %v214_v1, -inf }
  0x6d   : > { %v219_v6 = vld [vmem:[%s2255_s6 + $0x28] sm:$0xff]  ;;  %419 = vadd.xlane.f32.xlu1 %v312_v3  ;;  %415 = vadd.xlane.f32.xlu0 %v303_v4  ;;  %v477_v8 = vadd.f32 %v312_v3, %v303_v4  ;;  %v304_v10 = vsel %vm230_vm0, %v215_v5, 0.0  ;;  %v321_v12 = vsel %vm230_vm0, %v218_v7, 0.0  ;;  %v2286_v16 = vsel %vm230_vm0, %v215_v5, -inf  ;;  %v221_v20 = vld [vmem:[%s2255_s6 + $0x38] sm:$0xff]  ;;  %v220_v21 = vld [vmem:[%s2255_s6 + $0x30] sm:$0xff] }
  0x6e   : > { %v484_v11 = vadd.f32 %v313_v9, %v304_v10  ;;  %v322_v13 = vsel %vm230_vm0, %v219_v6, 0.0  ;;  %v2294_v18 = vsel %vm230_vm0, %v217_v2, -inf  ;;  %v2297_v19 = vsel %vm230_vm0, %v216_v0, -inf  ;;  %v223_v27 = vld [vmem:[%s2255_s6 + $0x48] sm:$0xff]  ;;  %v222_v28 = vld [vmem:[%s2255_s6 + $0x40] sm:$0xff]  ;;  %v225_v41 = vld [vmem:[%s2255_s6 + $0x58] sm:$0xff] }
  0x6f   : > { %v2281_v14 = vadd.f32 %v477_v8, %v321_v12  ;;  %v2304_v22 = vsel %vm230_vm0, %v221_v20, 0.0  ;;  %v2307_v23 = vsel %vm230_vm0, %v220_v21, 0.0  ;;  %v2312_v24 = vsel %vm230_vm0, %v219_v6, -inf  ;;  %v224_v42 = vld [vmem:[%s2255_s6 + $0x50] sm:$0xff]  ;;  %v227_v52 = vld [vmem:[%s2255_s6 + $0x68] sm:$0xff]  ;;  %v226_v53 = vld [vmem:[%s2255_s6 + $0x60] sm:$0xff] }
  0x70   : > { %v2283_v15 = vadd.f32 %v484_v11, %v322_v13  ;;  %v2315_v25 = vsel %vm230_vm0, %v218_v7, -inf  ;;  %v314_v26 = vadd.f32 %v313_v9, %v312_v3  ;;  %v305_v29 = vadd.f32 %v304_v10, %v303_v4  ;;  %v229_v5 = vld [vmem:[%s2255_s6 + $0x78] sm:$0xff]  ;;  %v228_v6 = vld [vmem:[%s2255_s6 + $0x70] sm:$0xff]  ;;  %s2052_s23 = smov 3   ;;  %s2591_s26 = scalar_lea.vmem [#allocation15], %s1675_s27 }
  0x71   : > { %421 = vadd.xlane.f32.xlu1 %v313_v9  ;;  %417 = vadd.xlane.f32.xlu0 %v304_v10  ;;  %v2322_v30 = vsel %vm230_vm0, %v223_v27, 0.0  ;;  %v2325_v31 = vsel %vm230_vm0, %v222_v28, 0.0  ;;  %v323_v33 = vadd.f32 %v322_v13, %v321_v12  ;;  %v233_v35 = vmax.f32 %v2289_v17, %v2286_v16  ;;  %s2595_s4 = smov 0  }
  0x72   : > { %v315_v32 = vrot.slane %v314_v26, 4  ;;  %v306_v34 = vrot.slane %v305_v29, 4  ;;  %v332_v36 = vadd.f32 %v2304_v22, %v2307_v23  ;;  %v2334_v37 = vsel %vm230_vm0, %v221_v20, -inf }
  0x73   : > { %v2337_v38 = vsel %vm230_vm0, %v220_v21, -inf  ;;  %v324_v40 = vrot.slane %v323_v33, 4  ;;  %v234_v44 = vrot.slane %v233_v35, 4  ;;  %v242_v45 = vmax.f32 %v2297_v19, %v2294_v18 }
  0x74   : > { %v316_v39 = vadd.f32 %v315_v32, %v314_v26  ;;  %v307_v43 = vadd.f32 %v306_v34, %v305_v29  ;;  %v333_v46 = vrot.slane %v332_v36, 4  ;;  %v341_v47 = vadd.f32 %v2322_v30, %v2325_v31 }
  0x75   : > { %425 = vadd.xlane.f32.xlu1 %v322_v13  ;;  %423 = vadd.xlane.f32.xlu0 %v321_v12  ;;  %v2348_v48 = vsel %vm230_vm0, %v225_v41, 0.0  ;;  %v2351_v49 = vsel %vm230_vm0, %v224_v42, 0.0  ;;  %v325_v51 = vadd.f32 %v324_v40, %v323_v33  ;;  %v235_v55 = vmax.f32 %v233_v35, %v234_v44 }
  0x76   : > { %v317_v50 = vrot.slane %v316_v39, 2  ;;  %v308_v54 = vrot.slane %v307_v43, 2  ;;  %v243_v56 = vrot.slane %v242_v45, 4  ;;  %v334_v57 = vadd.f32 %v333_v46, %v332_v36 }
  0x77   : > { %v251_v58 = vmax.f32 %v2315_v25, %v2312_v24  ;;  %v342_v59 = vrot.slane %v341_v47, 4  ;;  %v260_v60 = vmax.f32 %v2337_v38, %v2334_v37  ;;  %v350_v61 = vadd.f32 %v2348_v48, %v2351_v49 }
  0x78   : > { %v2364_v62 = vsel %vm230_vm0, %v223_v27, -inf  ;;  %v2367_v63 = vsel %vm230_vm0, %v222_v28, -inf  ;;  %v2370_v0 = vsel %vm230_vm0, %v227_v52, 0.0  ;;  %v2373_v1 = vsel %vm230_vm0, %v226_v53, 0.0 }
  0x79   : > { %385 = vmax.xlane.f32.xlu1 %v2286_v16  ;;  %383 = vmax.xlane.f32.xlu0 %v2289_v17  ;;  %2967 = vst [vmem:[#allocation20_spill] sm:$0xff] %v2370_v0  ;;  %2968 = vst [vmem:[#allocation21_spill] sm:$0xff] %v2373_v1  ;;  %v318_v2 = vadd.f32 %v317_v50, %v316_v39  ;;  %v326_v3 = vrot.slane %v325_v51, 2  ;;  %v359_v4 = vadd.f32 %v2370_v0, %v2373_v1  ;;  %vm521_vm3 = vcmask 1043459  }
  0x7a   : > { %v309_v7 = vadd.f32 %v308_v54, %v307_v43  ;;  %v236_v8 = vrot.slane %v235_v55, 2  ;;  %v244_v9 = vmax.f32 %v242_v45, %v243_v56  ;;  %v335_v10 = vrot.slane %v334_v57, 2 }
  0x7b   : > { %v252_v11 = vrot.slane %v251_v58, 4  ;;  %v343_v12 = vadd.f32 %v342_v59, %v341_v47  ;;  %v351_v13 = vrot.slane %v350_v61, 4  ;;  %v261_v20 = vrot.slane %v260_v60, 4 }
  0x7c   : > { %v269_v21 = vmax.f32 %v2367_v63, %v2364_v62  ;;  %v2384_v26 = vsel %vm230_vm0, %v229_v5, 0.0  ;;  %v2387_v27 = vsel %vm230_vm0, %v228_v6, 0.0  ;;  %v319_v28 = vrot.slane %v318_v2, 1 }
  0x7d   : > { %389 = vmax.xlane.f32.xlu1 %v2294_v18  ;;  %387 = vmax.xlane.f32.xlu0 %v2297_v19  ;;  %v327_v29 = vadd.f32 %v326_v3, %v325_v51  ;;  %v360_v32 = vrot.slane %v359_v4, 4  ;;  %v368_v33 = vadd.f32 %v2384_v26, %v2387_v27  ;;  %v310_v34 = vrot.slane %v309_v7, 1 }
  0x7e   : > { %v237_v35 = vmax.f32 %v235_v55, %v236_v8  ;;  %v245_v36 = vrot.slane %v244_v9, 2  ;;  %v336_v39 = vadd.f32 %v335_v10, %v334_v57  ;;  %v253_v40 = vmax.f32 %v251_v58, %v252_v11 }
  0x7f   : > { %v352_v43 = vadd.f32 %v351_v13, %v350_v61  ;;  %v2394_v44 = vsel %vm230_vm0, %v225_v41, -inf  ;;  %v2397_v45 = vsel %vm230_vm0, %v224_v42, -inf  ;;  %v344_v46 = vrot.slane %v343_v12, 2 }
  0x80   : > { %v262_v47 = vmax.f32 %v260_v60, %v261_v20  ;;  %v270_v50 = vrot.slane %v269_v21, 4  ;;  %v278_v51 = vmax.f32 %v2397_v45, %v2394_v44  ;;  %v361_v54 = vadd.f32 %v360_v32, %v359_v4 }
  0x81   : > { %429 = vadd.xlane.f32.xlu1 %v2304_v22  ;;  %427 = vadd.xlane.f32.xlu0 %v2307_v23  ;;  %v369_v55 = vrot.slane %v368_v33, 4  ;;  %v2402_v56 = vsel %vm230_vm0, %v227_v52, -inf  ;;  %v2405_v57 = vsel %vm230_vm0, %v226_v53, -inf  ;;  %v320_v41 = vadd.f32 %v319_v28, %v318_v2 }
  0x82   : > { %v311_v58 = vadd.f32 %v310_v34, %v309_v7  ;;  %v328_v59 = vrot.slane %v327_v29, 1  ;;  %v287_v42 = vmax.f32 %v2405_v57, %v2402_v56  ;;  %v246_v61 = vmax.f32 %v244_v9, %v245_v36 }
  0x83   : > { %v337_v60 = vrot.slane %v336_v39, 1  ;;  %v254_v3 = vrot.slane %v253_v40, 2  ;;  %v353_v8 = vrot.slane %v352_v43, 2  ;;  %v345_v52 = vadd.f32 %v344_v46, %v343_v12 }
  0x84   : > { %v263_v4 = vrot.slane %v262_v47, 2  ;;  %v271_v10 = vmax.f32 %v269_v21, %v270_v50  ;;  %v279_v53 = vrot.slane %v278_v51, 4  ;;  %v362_v11 = vrot.slane %v361_v54, 2 }
  0x85   : > { %393 = vmax.xlane.f32.xlu1 %v2312_v24  ;;  %391 = vmax.xlane.f32.xlu0 %v2315_v25  ;;  %v370_v2 = vadd.f32 %v369_v55, %v368_v33  ;;  %v2412_v7 = vsel %vm230_vm0, %v229_v5, -inf  ;;  %v2415_v13 = vsel %vm230_vm0, %v228_v6, -inf  ;;  %v329_v9 = vadd.f32 %v328_v59, %v327_v29 }
  0x86   : > { %v238_v20 = vrot.slane %v237_v35, 1  ;;  %v288_v28 = vrot.slane %v287_v42, 4  ;;  %v296_v32 = vmax.f32 %v2415_v13, %v2412_v7  ;;  %v376_v34 = vmul.f32 0.0625, %v320_v41 }
  0x87   : > { %v375_v36 = vmul.f32 0.0625, %v311_v58  ;;  %v255_v12 = vmax.f32 %v253_v40, %v254_v3  ;;  %v354_v46 = vadd.f32 %v353_v8, %v352_v43  ;;  %v247_v21 = vrot.slane %v246_v61, 1 }
  0x88   : > { %v346_v5 = vrot.slane %v345_v52, 1  ;;  %v272_v33 = vrot.slane %v271_v10, 2  ;;  %v280_v50 = vmax.f32 %v278_v51, %v279_v53  ;;  %v338_v6 = vadd.f32 %v337_v60, %v336_v39 }
  0x89   : > { %433 = vadd.xlane.f32.xlu1 %v2322_v30  ;;  %431 = vadd.xlane.f32.xlu0 %v2325_v31  ;;  %v264_v55 = vmax.f32 %v262_v47, %v263_v4  ;;  %v363_v29 = vadd.f32 %v362_v11, %v361_v54  ;;  %v371_v59 = vrot.slane %v370_v2, 2  ;;  %v289_v41 = vmax.f32 %v287_v42, %v288_v28 }
  0x8a   : > { %v297_v58 = vrot.slane %v296_v32, 4  ;;  %v544_v40 = vsel %vm517_vm1, %v376_v34, %v375_v36  ;;  %v239_v43 = vmax.f32 %v237_v35, %v238_v20  ;;  %v256_v3 = vrot.slane %v255_v12, 1 }
  0x8b   : > { %v355_v8 = vrot.slane %v354_v46, 1  ;;  %v248_v51 = vmax.f32 %v246_v61, %v247_v21  ;;  %v347_v39 = vadd.f32 %v346_v5, %v345_v52  ;;  %v273_v47 = vmax.f32 %v271_v10, %v272_v33 }
  0x8c   : > { %v281_v54 = vrot.slane %v280_v50, 2  ;;  %v378_v60 = vmul.f32 0.0625, %v338_v6  ;;  %v265_v4 = vrot.slane %v264_v55, 1  ;;  %v364_v53 = vrot.slane %v363_v29, 1 }
  0x8d   : > { %397 = vmax.xlane.f32.xlu1 %v2334_v37  ;;  %395 = vmax.xlane.f32.xlu0 %v2337_v38  ;;  %v372_v11 = vadd.f32 %v371_v59, %v370_v2  ;;  %v479_v35 = vadd.f32 %v2281_v14, %v2307_v23  ;;  %v356_v20 = vadd.f32 %v355_v8, %v354_v46  ;;  %v379_v52 = vmul.f32 0.0625, %v347_v39 }
  0x8e   : > { %v518_v61 = vsel %vm517_vm1, %v248_v51, %v239_v43  ;;  %v274_v10 = vrot.slane %v273_v47, 1  ;;  %v282_v28 = vmax.f32 %v280_v50, %v281_v54  ;;  %v365_v2 = vadd.f32 %v364_v53, %v363_v29 }
  0x8f   : > { %v373_v34 = vrot.slane %v372_v11, 1  ;;  %vm523_vm4 = vcmask 1044484   ;;  %v266_v14 = vmax.f32 %v264_v55, %v265_v4  ;;  %v380_v21 = vmul.f32 0.0625, %v356_v20 }
  0x90   : > { %v464_v33 = vmax.f32 %v2297_v19, %v2337_v38  ;;  %v283_v50 = vrot.slane %v282_v28, 1  ;;  %vm525_vm5 = vcmask 1045509   ;;  %v381_v29 = vmul.f32 0.0625, %v365_v2 }
  0x91   : > { %437 = vadd.xlane.f32.xlu1 %v2348_v48  ;;  %435 = vadd.xlane.f32.xlu0 %v2351_v49  ;;  %v374_v55 = vadd.f32 %v373_v34, %v372_v11  ;;  %vm527_vm6 = vcmask 1046534   ;;  %vm493_vm7 = vcmask 179200   ;;  %vm495_vm8 = vcmask 177152   ;;  %v2970_v11 = vld [vmem:[#allocation20_spill] sm:$0xff] }
  0x92   : > { %v471_v19 = vmax.f32 %v2294_v18, %v2334_v37  ;;  %v284_v38 = vmax.f32 %v282_v28, %v283_v50  ;;  %vm529_vm9 = vcmask 1047559   ;;  %vm583_vm10 = vcmask 154712  }
  0x93   : > { %v382_v37 = vmul.f32 0.0625, %v374_v55  ;;  %vm534_vm11 = vcmask 154648  }
  0x94   : > { %v473_v8 = vmax.f32 %v471_v19, %v2394_v44 }
  0x95   : > { %401 = vmax.xlane.f32.xlu1 %v2364_v62  ;;  %399 = vmax.xlane.f32.xlu0 %v2367_v63 }
  0x99   : > { %441 = vadd.xlane.f32.xlu1 %v2370_v0  ;;  %439 = vadd.xlane.f32.xlu0 %v2373_v1  ;;  %v377_v0 = vmul.f32 0.0625, %v329_v9  ;;  %v486_v1 = vadd.f32 %v2283_v15, %v2304_v22  ;;  %v290_v15 = vrot.slane %v289_v41, 2  ;;  %v298_v22 = vmax.f32 %v296_v32, %v297_v58 }
  0x9a   : > { %v257_v9 = vmax.f32 %v255_v12, %v256_v3  ;;  %v463_v12 = vmax.f32 %v2289_v17, %v2315_v25 }
  0x9b   : > { %v545_v42 = vsel %vm519_vm2, %v377_v0, %v544_v40  ;;  %v470_v0 = vmax.f32 %v2286_v16, %v2312_v24  ;;  %v291_v23 = vmax.f32 %v289_v41, %v290_v15  ;;  %v299_v36 = vrot.slane %v298_v22, 2 }
  0x9c   : > { %v546_v32 = vsel %vm521_vm3, %v378_v60, %v545_v42  ;;  %v487_v46 = vadd.f32 %v486_v1, %v2322_v30  ;;  %v520_v5 = vsel %vm519_vm2, %v257_v9, %v518_v61  ;;  %v480_v16 = vadd.f32 %v479_v35, %v2325_v31 }
  0x9d   : > { %405 = vmax.xlane.f32.xlu1 %v2394_v44  ;;  %403 = vmax.xlane.f32.xlu0 %v2397_v45  ;;  %v547_v6 = vsel %vm523_vm4, %v379_v52, %v546_v32  ;;  %v275_v24 = vmax.f32 %v273_v47, %v274_v10  ;;  %v292_v59 = vrot.slane %v291_v23, 1  ;;  %v300_v41 = vmax.f32 %v298_v22, %v299_v36  ;;  %v2969_v47 = vld [vmem:[#allocation21_spill] sm:$0xff] }
  0x9e   : > { %v522_v17 = vsel %vm521_vm3, %v266_v14, %v520_v5  ;;  %v548_v25 = vsel %vm525_vm5, %v380_v21, %v547_v6  ;;  %v465_v30 = vmax.f32 %v463_v12, %v2367_v63  ;;  %v466_v31 = vmax.f32 %v464_v33, %v2397_v45 }
  0x9f   : > { %v2051_v1 = vmov 0.0   ;;  %v481_v18 = vadd.f32 %v480_v16, %v2351_v49  ;;  %v524_v63 = vsel %vm523_vm4, %v275_v24, %v522_v17  ;;  %v549_v45 = vsel %vm527_vm6, %v381_v29, %v548_v25 }
  0xa0   : > { %501 = vst.msk [vmem:[#allocation5] sm:$0xff] %vm493_vm7, %v2051_v1  ;;  %494 = vst.msk [vmem:[#allocation2] sm:$0xff] %vm493_vm7, %v2051_v1  ;;  %v301_v58 = vrot.slane %v300_v41, 1  ;;  %v488_v40 = vadd.f32 %v487_v46, %v2348_v48  ;;  %v472_v43 = vmax.f32 %v470_v0, %v2364_v62  ;;  %v293_v3 = vmax.f32 %v291_v23, %v292_v59 }
  0xa1   : > { %445 = vadd.xlane.f32.xlu1 %v2384_v26  ;;  %443 = vadd.xlane.f32.xlu0 %v2387_v27  ;;  %502 = vst.msk [vmem:[#allocation5 + $0x8] sm:$0x3f] %vm495_vm8, %v2051_v1  ;;  %496 = vst.msk [vmem:[#allocation2 + $0x8] sm:$0x3f] %vm495_vm8, %v2051_v1  ;;  %v467_v51 = vmax.f32 %v465_v30, %v2405_v57  ;;  %v468_v39 = vmax.f32 %v466_v31, %v2415_v13  ;;  %v571_v23 = vlaneseq }
  0xa2   : > { %497 = vst.msk [vmem:[#allocation3] sm:$0xff] %vm493_vm7, %v2051_v1  ;;  %499 = vst.msk [vmem:[#allocation4] sm:$0xff] %vm493_vm7, %v2051_v1  ;;  %v526_v49 = vsel %vm525_vm5, %v284_v38, %v524_v63  ;;  %v482_v54 = vadd.f32 %v481_v18, %v2969_v47  ;;  %v550_v60 = vsel %vm529_vm9, %v382_v37, %v549_v45 }
  0xa3   : > { %498 = vst.msk [vmem:[#allocation3 + $0x8] sm:$0x3f] %vm495_vm8, %v2051_v1  ;;  %500 = vst.msk [vmem:[#allocation4 + $0x8] sm:$0x3f] %vm495_vm8, %v2051_v1  ;;  %v302_v4 = vmax.f32 %v300_v41, %v301_v58  ;;  %v528_v53 = vsel %vm527_vm6, %v293_v3, %v526_v49  ;;  %v489_v48 = vadd.f32 %v488_v40, %v2970_v11  ;;  %v572_v46 = vand.u32 127, %v571_v23 }
  0xa4   : > { %503 = vst.msk [vmem:[#allocation6] sm:$0xff] %vm493_vm7, %v2051_v1  ;;  %504 = vst.msk [vmem:[#allocation6 + $0x8] sm:$0xff] %vm493_vm7, %v2051_v1  ;;  %v474_v62 = vmax.f32 %v472_v43, %v2402_v56  ;;  %v475_v15 = vmax.f32 %v473_v8, %v2412_v7  ;;  %v469_v44 = vmax.f32 %v467_v51, %v468_v39  ;;  %v2497_v6 = vshrl.u32 %v571_v23, 7 }
  0xa5   : > { %409 = vmax.xlane.f32.xlu1 %v2402_v56  ;;  %407 = vmax.xlane.f32.xlu0 %v2405_v57  ;;  %505 = vst.msk [vmem:[#allocation6 + $0x10] sm:$0x3f] %vm495_vm8, %v2051_v1  ;;  %508 = vst.msk [vmem:[#allocation7 + $0x10] sm:$0x3f] %vm495_vm8, %v2051_v1  ;;  %v483_v57 = vadd.f32 %v482_v54, %v2387_v27  ;;  %v490_v22 = vadd.f32 %v489_v48, %v2384_v26  ;;  %v578_v33 = vadd.s32 4294967285, %v572_v46 }
  0xa6   : > { %506 = vst.msk [vmem:[#allocation7] sm:$0xff] %vm493_vm7, %v2051_v1  ;;  %507 = vst.msk [vmem:[#allocation7 + $0x8] sm:$0xff] %vm493_vm7, %v2051_v1  ;;  %v476_v42 = vmax.f32 %v474_v62, %v475_v15  ;;  %v573_v50 = vadd.s32 4294967293, %v572_v46 }
  0xa7   : > { %v491_v35 = vmul.f32 0.125, %v483_v57  ;;  %v492_v9 = vmul.f32 0.125, %v490_v22  ;;  %v2500_v29 = vsub.s32 %v578_v33, %v2497_v6 }
  0xa8   : > { %v2503_v17 = vsub.s32 %v573_v50, %v2497_v6 }
  0xa9   : > { %413 = vmax.xlane.f32.xlu1 %v2412_v7  ;;  %411 = vmax.xlane.f32.xlu0 %v2415_v13  ;;  %v530_v13 = vsel %vm529_vm9, %v302_v4, %v528_v53 }
  0xba   : > { %551 = vrot.lane.b32.xlu1 %v550_v60, %s2052_s23 }
  0xbe   : > { %756 = vrot.lane.b32.xlu1 %v469_v44, %s2052_s23 }
  0xbf   : > { %531 = vrot.lane.b32.xlu0 %v530_v13, %s2052_s23 }
  0xc2   : > { %758 = vrot.lane.b32.xlu1 %v476_v42, %s2052_s23 }
  0xc3   : > { %766 = vrot.lane.b32.xlu0 %v491_v35, %s2052_s23 }
  0xc6   : > { %768 = vrot.lane.b32.xlu1 %v492_v9, %s2052_s23 }
  0xfa   : > { %v420_v56 = vpop.xlane.xlu1 %419  ;;  %v416_v20 = vpop.xlane.xlu0 %415 }
  0xfb   : > { %v447_v55 = vmul.f32 0.0625, %v416_v20  ;;  %v449_v25 = vmul.f32 0.0625, %v420_v56 }
  0xfd   : > { %v676_v1 = vrot.slane %v447_v55, %v2503_v17  ;;  %v685_v58 = vrot.slane %v449_v25, %v2503_v17 }
  0xfe   : > { %v422_v7 = vpop.xlane.xlu1 %421  ;;  %v418_v61 = vpop.xlane.xlu0 %417 }
  0xff   : > { %v450_v59 = vmul.f32 0.0625, %v422_v7  ;;  %v448_v41 = vmul.f32 0.0625, %v418_v61 }
 0x101   : > { %v689_v18 = vrot.slane %v450_v59, %v2500_v29  ;;  %v680_v37 = vrot.slane %v448_v41, %v2500_v29 }
 0x102   : > { %v426_v52 = vpop.xlane.xlu1 %425  ;;  %v424_v10 = vpop.xlane.xlu0 %423 }
 0x103   : > { %v452_v19 = vmul.f32 0.0625, %v426_v52  ;;  %v451_v30 = vmul.f32 0.0625, %v424_v10  ;;  %v690_v49 = vsel %vm583_vm10, %v689_v18, %v685_v58  ;;  %v681_v47 = vsel %vm583_vm10, %v680_v37, %v676_v1 }
 0x104   : > { %v745_v35 = vsel %vm517_vm1, %v690_v49, %v681_v47 }
 0x105   : > { %v698_v3 = vrot.slane %v452_v19, %v2500_v29  ;;  %v694_v8 = vrot.slane %v451_v30, %v2503_v17 }
 0x106   : > { %v2481_v28 = vpop.xlane.xlu1 %385  ;;  %v2483_v27 = vpop.xlane.xlu0 %383 }
 0x107   : > { %v699_v13 = vsel %vm583_vm10, %v698_v3, %v694_v8  ;;  %v582_v20 = vrot.slane %v2481_v28, %v2500_v29 }
 0x108   : > { %v746_v10 = vsel %vm519_vm2, %v699_v13, %v745_v35 }
 0x10a   : > { %v2485_v2 = vpop.xlane.xlu1 %389  ;;  %v2487_v26 = vpop.xlane.xlu0 %387 }
 0x10b   : > { %v592_v62 = vrot.slane %v2485_v2, %v2500_v29  ;;  %v588_v15 = vrot.slane %v2487_v26, %v2503_v17  ;;  %v577_v2 = vrot.slane %v2483_v27, %v2503_v17 }
 0x10d   : > { %v593_v26 = vsel %vm583_vm10, %v592_v62, %v588_v15  ;;  %v584_v25 = vsel %vm583_vm10, %v582_v20, %v577_v2 }
 0x10e   : > { %v430_v34 = vpop.xlane.xlu1 %429  ;;  %v428_v32 = vpop.xlane.xlu0 %427  ;;  %v648_v58 = vsel %vm517_vm1, %v593_v26, %v584_v25 }
 0x10f   : > { %v454_v63 = vmul.f32 0.0625, %v430_v34  ;;  %v453_v45 = vmul.f32 0.0625, %v428_v32 }
 0x111   : > { %v707_v4 = vrot.slane %v454_v63, %v2500_v29  ;;  %v703_v53 = vrot.slane %v453_v45, %v2503_v17 }
 0x112   : > { %v2489_v0 = vpop.xlane.xlu1 %393  ;;  %v2491_v14 = vpop.xlane.xlu0 %391 }
 0x113   : > { %v708_v7 = vsel %vm583_vm10, %v707_v4, %v703_v53  ;;  %v601_v32 = vrot.slane %v2489_v0, %v2500_v29  ;;  %v597_v28 = vrot.slane %v2491_v14, %v2503_v17 }
 0x114   : > { %v747_v27 = vsel %vm521_vm3, %v708_v7, %v746_v10 }
 0x115   : > { %v602_v19 = vsel %vm583_vm10, %v601_v32, %v597_v28 }
 0x116   : > { %v434_v36 = vpop.xlane.xlu1 %433  ;;  %v432_v12 = vpop.xlane.xlu0 %431  ;;  %v649_v3 = vsel %vm519_vm2, %v602_v19, %v648_v58 }
 0x117   : > { %v456_v40 = vmul.f32 0.0625, %v434_v36  ;;  %v455_v43 = vmul.f32 0.0625, %v432_v12 }
 0x119   : > { %v716_v44 = vrot.slane %v456_v40, %v2500_v29  ;;  %v712_v57 = vrot.slane %v455_v43, %v2503_v17 }
 0x11a   : > { %v2493_v21 = vpop.xlane.xlu1 %397  ;;  %v2495_v5 = vpop.xlane.xlu0 %395 }
 0x11b   : > { %v717_v34 = vsel %vm583_vm10, %v716_v44, %v712_v57  ;;  %v610_v23 = vrot.slane %v2493_v21, %v2500_v29  ;;  %v606_v36 = vrot.slane %v2495_v5, %v2503_v17 }
 0x11d   : > { %v611_v30 = vsel %vm583_vm10, %v610_v23, %v606_v36 }
 0x11e   : > { %v438_v16 = vpop.xlane.xlu1 %437  ;;  %v436_v24 = vpop.xlane.xlu0 %435 }
 0x11f   : > { %v458_v54 = vmul.f32 0.0625, %v438_v16  ;;  %v457_v60 = vmul.f32 0.0625, %v436_v24  ;;  %v748_v24 = vsel %vm523_vm4, %v717_v34, %v747_v27 }
 0x121   : > { %v725_v9 = vrot.slane %v458_v54, %v2500_v29  ;;  %v721_v56 = vrot.slane %v457_v60, %v2503_v17 }
 0x122   : > { %v2505_v38 = vpop.xlane.xlu1 %401  ;;  %v2507_v31 = vpop.xlane.xlu0 %399 }
 0x123   : > { %v726_v33 = vsel %vm583_vm10, %v725_v9, %v721_v56  ;;  %v619_v0 = vrot.slane %v2505_v38, %v2500_v29  ;;  %v615_v14 = vrot.slane %v2507_v31, %v2503_v17 }
 0x124   : > { %v749_v38 = vsel %vm525_vm5, %v726_v33, %v748_v24 }
 0x125   : > { %v620_v40 = vsel %vm583_vm10, %v619_v0, %v615_v14 }
 0x126   : > { %v442_v51 = vpop.xlane.xlu1 %441  ;;  %v440_v39 = vpop.xlane.xlu0 %439 }
 0x127   : > { %v460_v11 = vmul.f32 0.0625, %v442_v51  ;;  %v459_v48 = vmul.f32 0.0625, %v440_v39  ;;  %v650_v51 = vsel %vm521_vm3, %v611_v30, %v649_v3 }
 0x128   : > { %v651_v54 = vsel %vm523_vm4, %v620_v40, %v650_v51 }
 0x129   : > { %v734_v61 = vrot.slane %v460_v11, %v2500_v29  ;;  %v730_v52 = vrot.slane %v459_v48, %v2503_v17 }
 0x12a   : > { %v406_v22 = vpop.xlane.xlu1 %405  ;;  %v404_v42 = vpop.xlane.xlu0 %403 }
 0x12b   : > { %v735_v21 = vsel %vm583_vm10, %v734_v61, %v730_v52  ;;  %v628_v5 = vrot.slane %v406_v22, %v2500_v29  ;;  %v624_v55 = vrot.slane %v404_v42, %v2503_v17  ;;  %v2593_v22 = vmov 0.0  }
 0x12c   : > { %v750_v18 = vsel %vm527_vm6, %v735_v21, %v749_v38 }
 0x12d   : > { %v629_v8 = vsel %vm583_vm10, %v628_v5, %v624_v55 }
 0x12e   : > { %v446_v12 = vpop.xlane.xlu1 %445  ;;  %v444_v46 = vpop.xlane.xlu0 %443  ;;  %v652_v53 = vsel %vm525_vm5, %v629_v8, %v651_v54 }
 0x12f   : > { %v462_v50 = vmul.f32 0.0625, %v446_v12  ;;  %v461_v16 = vmul.f32 0.0625, %v444_v46 }
 0x131   : > { %v743_v59 = vrot.slane %v462_v50, %v2500_v29  ;;  %v739_v41 = vrot.slane %v461_v16, %v2503_v17 }
 0x132   : > { %v410_v1 = vpop.xlane.xlu1 %409  ;;  %v408_v31 = vpop.xlane.xlu0 %407 }
 0x133   : > { %v744_v37 = vsel %vm583_vm10, %v743_v59, %v739_v41  ;;  %v637_v63 = vrot.slane %v410_v1, %v2500_v29  ;;  %v633_v45 = vrot.slane %v408_v31, %v2503_v17 }
 0x134   : > { %v751_v43 = vsel %vm529_vm9, %v744_v37, %v750_v18 }
 0x135   : > { %753 = vst.msk [vmem:[#allocation5 + $0x3] sm:$0xff] %vm534_vm11, %v751_v43  ;;  %v638_v39 = vsel %vm583_vm10, %v637_v63, %v633_v45 }
 0x136   : > { %v414_v49 = vpop.xlane.xlu1 %413  ;;  %v412_v47 = vpop.xlane.xlu0 %411  ;;  %v653_v11 = vsel %vm527_vm6, %v638_v39, %v652_v53 }
 0x137   : > { %v646_v60 = vrot.slane %v414_v49, %v2500_v29  ;;  %v642_v4 = vrot.slane %v412_v47, %v2503_v17 }
 0x139   : > { %v647_v48 = vsel %vm583_vm10, %v646_v60, %v642_v4 }
 0x13a   : > { %v654_v62 = vsel %vm529_vm9, %v647_v48, %v653_v11  ;;  %v552_v15 = vpop.permute.xlu1 %551  ;;  %v532_v44 = vpop.permute.xlu0 %531 }
 0x13b   : > { %656 = vst.msk [vmem:[#allocation4 + $0x3] sm:$0xff] %vm534_vm11, %v654_v62  ;;  %554 = vst.msk [vmem:[#allocation3 + $0x3] sm:$0xff] %vm534_vm11, %v552_v15 }
 0x13c   : > { %535 = vst.msk [vmem:[#allocation2 + $0x3] sm:$0xff] %vm534_vm11, %v532_v44 }
 0x13e   : > { %v757_v29 = vpop.permute.xlu1 %756  ;;  %v767_v57 = vpop.permute.xlu0 %766 }
 0x13f   : > { %762 = vst.msk [vmem:[#allocation6 + $0x3] sm:$0xff] %vm534_vm11, %v757_v29  ;;  %772 = vst.msk [vmem:[#allocation7 + $0x3] sm:$0xff] %vm534_vm11, %v767_v57 }
 0x142   : > { %v759_v17 = vpop.permute.xlu1 %758 }
 0x143   : > { %763 = vst.msk [vmem:[#allocation6 + $0xb] sm:$0xff] %vm534_vm11, %v759_v17 }
 0x146   : > { %v769_v13 = vpop.permute.xlu1 %768 }
 0x147   : > { %773 = vst.msk [vmem:[#allocation7 + $0xb] sm:$0xff] %vm534_vm11, %v769_v13 }
 0x148 LB: >> { %s2604_s19 = smul.u32 7, %s2024_s4  ;;  %s782_s20 = scalar_lea.vmem [#allocation2], %s2024_s4  ;;  %s2024_s4 = sphi %s2595_s4, %s779_s4   ;;  %v2020_v22 = vphi %v2593_v22, %v2974_v22  }
 0x149   : >> { %v783_v42 = vld [vmem:[%s782_s20] sm:$0xff]  ;;  %s2058_s1 = smov 122  }
 0x14a   : >> { %s788_s30 = sadd.s32 1, %s2604_s19  ;;  %s806_s22 = sadd.s32 3, %s2604_s19 }
 0x14b   : >> { %s789_s7 = sld [smem:[#allocation13 + %s788_s30]]  ;;  %s797_s5 = sadd.s32 2, %s2604_s19 }
 0x14c   : >> { %s807_s8 = sld [smem:[#allocation13 + %s806_s22]]  ;;  %s815_s9 = sadd.s32 4, %s2604_s19 }
 0x14d   : >> { %s798_s10 = sld [smem:[#allocation13 + %s797_s5]]  ;;  %s824_s17 = sadd.s32 5, %s2604_s19 }
 0x14e   : >> { %s816_s11 = sld [smem:[#allocation13 + %s815_s9]]  ;;  %s833_s28 = sadd.s32 6, %s2604_s19 }
 0x14f   : >> { %s2612_s27 = sld [smem:[#allocation13 + %s824_s17]]  ;;  %s849_s23 = sadd.s32 50, %s2604_s19 }
 0x150   : >> { %s2615_s6 = sld [smem:[#allocation13 + %s833_s28]]  ;;  %s858_s22 = sadd.s32 51, %s2604_s19 }
 0x151   : >> { %v790_v35 = vstv %s789_s7  ;;  %s2618_s30 = sld [smem:[#allocation13 + %s849_s23]]  ;;  %s867_s9 = sadd.s32 52, %s2604_s19 }
 0x152   : >> { %v808_v9 = vstv %s807_s8  ;;  %v791_v56 = vmul.f32 %v790_v35, %v783_v42  ;;  %s2621_s5 = sld [smem:[#allocation13 + %s858_s22]]  ;;  %s2944_s17 = smov 127  }
 0x153   : >> { %v809_v20 = vmul.f32 %v808_v9, %v783_v42  ;;  %v799_v7 = vstv %s798_s10  ;;  %s2945_s7 = smov 125   ;;  %s2626_s8 = sld [smem:[#allocation13 + %s867_s9]] }
 0x154   : >> { %v817_v61 = vstv %s816_s11  ;;  %793 = vrot.lane.b32.xlu0 %v791_v56, %s2944_s17  ;;  %v800_v52 = vmul.f32 %v799_v7, %v783_v42  ;;  %s876_s20 = sadd.s32 53, %s2604_s19  ;;  %s885_s11 = sadd.s32 54, %s2604_s19 }
 0x155   : >> { %811 = vrot.lane.b32.xlu1 %v809_v20, %s2945_s7  ;;  %v818_v10 = vmul.f32 %v817_v61, %v783_v42  ;;  %v826_v2 = vstv %s2612_s27  ;;  %s2630_s10 = sld [smem:[#allocation13 + %s876_s20]]  ;;  %s894_s28 = sadd.s32 55, %s2604_s19 }
 0x156   : >> { %v835_v26 = vstv %s2615_s6  ;;  %s784_s23 = sld [smem:[#allocation13 + %s2604_s19]]  ;;  %s2055_s22 = smov 126   ;;  %v827_v34 = vmul.f32 %v826_v2, %v783_v42 }
 0x157   : >> { %s2946_s17 = smov 124   ;;  %v836_v32 = vmul.f32 %v835_v26, %v783_v42  ;;  %s886_s9 = sld [smem:[#allocation13 + %s885_s11]]  ;;  %v851_v23 = vstv %s2618_s30 }
 0x158   : >> { %802 = vrot.lane.b32.xlu0 %v800_v52, %s2055_s22  ;;  %s842_s7 = sadd.s32 49, %s2604_s19  ;;  %s843_s27 = scalar_lea.vmem [#allocation3], %s2024_s4  ;;  %v860_v36 = vstv %s2621_s5 }
 0x159   : >> { %820 = vrot.lane.b32.xlu1 %v818_v10, %s2946_s17  ;;  %v844_v28 = vld [vmem:[%s843_s27] sm:$0xff]  ;;  %s895_s20 = sld [smem:[#allocation13 + %s894_s28]]  ;;  %s2057_s6 = smov 123   ;;  %v869_v27 = vstv %s2626_s8 }
 0x15a   : >> { %s845_s0 = sld [smem:[#allocation13 + %s842_s7]]  ;;  %v852_v12 = vmul.f32 %v851_v23, %v844_v28  ;;  %v861_v46 = vmul.f32 %v860_v36, %v844_v28  ;;  %s2971_s17 = smov 127   ;;  %v870_v0 = vmul.f32 %v869_v27, %v844_v28 }
 0x15b   : >> { %v878_v33 = vstv %s2630_s10  ;;  %s2972_s19 = smov 125   ;;  %s2973_s30 = smov 124  }
 0x15c   : >> { %829 = vrot.lane.b32.xlu0 %v827_v34, %s2057_s6  ;;  %v785_v50 = vstv %s784_s23  ;;  %v879_v14 = vmul.f32 %v878_v33, %v844_v28  ;;  %s779_s4 = sadd.s32 1, %s2024_s4  }
 0x15d   : >> { %838 = vrot.lane.b32.xlu1 %v836_v32, %s2058_s1  ;;  %v786_v16 = vmul.f32 %v785_v50, %v783_v42  ;;  %v887_v5 = vstv %s886_s9  ;;  %p776_p0 = scmp.ge.s32.totalorder %s779_s4, 7  }
 0x15e   : >> { %v888_v59 = vmul.f32 %v887_v5, %v844_v28  ;;  %v2654_v42 = vmov (%p776_p0), 0.0  }
 0x15f   : >> { %v896_v55 = vstv %s895_s20  ;;  %v787_v25 = vadd.f32 %v2020_v22, %v786_v16 }
 0x160   : >> { %v846_v24 = vstv %s845_s0  ;;  %854 = vrot.lane.b32.xlu0 %v852_v12, %s2971_s17  ;;  %v897_v41 = vmul.f32 %v896_v55, %v844_v28  ;;  %s903_s0 = sld [smem:[#allocation14]] (%p776_p0) }
 0x161   : >> { %863 = vrot.lane.b32.xlu1 %v861_v46, %s2055_s22  ;;  %v847_v21 = vmul.f32 %v846_v24, %v844_v28 }
 0x164   : >> { %872 = vrot.lane.b32.xlu0 %v870_v0, %s2972_s19 }
 0x165   : >> { %881 = vrot.lane.b32.xlu1 %v879_v14, %s2973_s30 }
 0x166   : > { %v904_v15 = vstv (%p776_p0), %s903_s0 }
 0x168   : >> { %890 = vrot.lane.b32.xlu0 %v888_v59, %s2057_s6 }
 0x169   : >> { %899 = vrot.lane.b32.xlu1 %v897_v41, %s2058_s1  ;;  %s2656_s1 = smov (%p776_p0), 0  }
 0x1c6   : >> { %v794_v19 = vpop.permute.xlu0 %793 }
 0x1c7   : >> { %v812_v30 = vpop.permute.xlu1 %811  ;;  %v796_v38 = vadd.f32 %v794_v19, %v787_v25 }
 0x1ca   : >> { %v803_v1 = vpop.permute.xlu0 %802 }
 0x1cb   : >> { %v821_v31 = vpop.permute.xlu1 %820  ;;  %v805_v18 = vadd.f32 %v803_v1, %v796_v38 }
 0x1cd   : >> { %v814_v37 = vadd.f32 %v812_v30, %v805_v18 }
 0x1ce   : >> { %v830_v63 = vpop.permute.xlu0 %829 }
 0x1cf   : >> { %v839_v45 = vpop.permute.xlu1 %838  ;;  %v823_v58 = vadd.f32 %v821_v31, %v814_v37 }
 0x1d1   : >> { %v832_v40 = vadd.f32 %v830_v63, %v823_v58 }
 0x1d2   : >> { %v855_v43 = vpop.permute.xlu0 %854 }
 0x1d3   : >> { %v864_v3 = vpop.permute.xlu1 %863  ;;  %v841_v8 = vadd.f32 %v839_v45, %v832_v40 }
 0x1d5   : >> { %v848_v51 = vadd.f32 %v847_v21, %v841_v8 }
 0x1d6   : >> { %v873_v39 = vpop.permute.xlu0 %872 }
 0x1d7   : >> { %v857_v49 = vadd.f32 %v855_v43, %v848_v51  ;;  %v882_v47 = vpop.permute.xlu1 %881 }
 0x1d9   : >> { %v866_v54 = vadd.f32 %v864_v3, %v857_v49 }
 0x1da   : >> { %v891_v4 = vpop.permute.xlu0 %890 }
 0x1db   : >> { %v875_v60 = vadd.f32 %v873_v39, %v866_v54  ;;  %v900_v11 = vpop.permute.xlu1 %899 }
 0x1dd   : >> { %v884_v53 = vadd.f32 %v882_v47, %v875_v60  ;;  %778 = sbr.rel (!%p776_p0) target bundleno = 328 (0x148), region = 114 }
 0x1df   : >> { %v893_v48 = vadd.f32 %v891_v4, %v884_v53 }
 0x1e1   : >> { %v902_v62 = vadd.f32 %v900_v11, %v893_v48  }
 0x1e3   : >> { %v2974_v22 = vmov %v902_v62  ;;  %v905_v44 = vadd.f32 (%p776_p0), %v904_v15, %v902_v62 }
 0x1e5   : > { %v1679_v29 = vmul.f32 -1.442695, %v905_v44 }
 0x1e7   : > { %1840 = vpow2.f32 %v1679_v29 }
 0x1f1   : > { %v1841_v57 = vpop.eup %1840 }
 0x1f2   : > { %v909_v17 = vadd.f32 1.0, %v1841_v57 }
 0x1f4   : > { %1842 = vrcp.f32 %v909_v17 }
 0x1fe   : > { %v1843_v13 = vpop.eup %1842 }
 0x1ff   : > { %v2652_v22 = vmul.f32 %v1843_v13, %v905_v44 }
 0x200 LB: >> { %s2665_s4 = smul.u32 7, %s2032_s1  ;;  %s922_s9 = scalar_lea.vmem [#allocation4], %s2032_s1  ;;  %s2032_s1 = sphi %s2656_s1, %s918_s1   ;;  %v2028_v42 = vphi %v2654_v42, %v2977_v42  }
 0x201   : >> { %v923_v35 = vld [vmem:[%s922_s9] sm:$0xff] }
 0x202   : >> { %s928_s5 = sadd.s32 99, %s2665_s4  ;;  %s946_s17 = sadd.s32 101, %s2665_s4 }
 0x203   : >> { %s929_s7 = sld [smem:[#allocation13 + %s928_s5]]  ;;  %s937_s10 = sadd.s32 100, %s2665_s4 }
 0x204   : >> { %s947_s8 = sld [smem:[#allocation13 + %s946_s17]]  ;;  %s955_s11 = sadd.s32 102, %s2665_s4 }
 0x205   : >> { %s938_s28 = sld [smem:[#allocation13 + %s937_s10]]  ;;  %s964_s22 = sadd.s32 103, %s2665_s4 }
 0x206   : >> { %s956_s23 = sld [smem:[#allocation13 + %s955_s11]]  ;;  %s973_s20 = sadd.s32 104, %s2665_s4 }
 0x207   : >> { %s2673_s27 = sld [smem:[#allocation13 + %s964_s22]]  ;;  %s989_s19 = sadd.s32 148, %s2665_s4 }
 0x208   : >> { %s2676_s6 = sld [smem:[#allocation13 + %s973_s20]]  ;;  %s998_s0 = sadd.s32 149, %s2665_s4 }
 0x209   : >> { %v930_v9 = vstv %s929_s7  ;;  %s2679_s30 = sld [smem:[#allocation13 + %s989_s19]]  ;;  %s1007_s17 = sadd.s32 150, %s2665_s4 }
 0x20a   : >> { %v948_v56 = vstv %s947_s8  ;;  %v931_v20 = vmul.f32 %v930_v9, %v923_v35  ;;  %s2682_s5 = sld [smem:[#allocation13 + %s998_s0]]  ;;  %s2948_s10 = smov 127  }
 0x20b   : >> { %v949_v7 = vmul.f32 %v948_v56, %v923_v35  ;;  %v939_v61 = vstv %s938_s28  ;;  %s2947_s7 = smov 125   ;;  %s2687_s8 = sld [smem:[#allocation13 + %s1007_s17]] }
 0x20c   : >> { %v957_v52 = vstv %s956_s23  ;;  %933 = vrot.lane.b32.xlu0 %v931_v20, %s2948_s10  ;;  %v940_v10 = vmul.f32 %v939_v61, %v923_v35  ;;  %s1016_s11 = sadd.s32 151, %s2665_s4  ;;  %s1025_s23 = sadd.s32 152, %s2665_s4 }
 0x20d   : >> { %951 = vrot.lane.b32.xlu1 %v949_v7, %s2947_s7  ;;  %v958_v2 = vmul.f32 %v957_v52, %v923_v35  ;;  %v966_v26 = vstv %s2673_s27  ;;  %s2691_s28 = sld [smem:[#allocation13 + %s1016_s11]]  ;;  %s1034_s22 = sadd.s32 153, %s2665_s4 }
 0x20e   : >> { %v975_v34 = vstv %s2676_s6  ;;  %s2696_s9 = sld [smem:[#allocation13 + %s1025_s23]]  ;;  %s921_s20 = sadd.s32 98, %s2665_s4  ;;  %v967_v32 = vmul.f32 %v966_v26, %v923_v35 }
 0x20f   : >> { %s2061_s19 = smov 126   ;;  %s2062_s0 = smov 124   ;;  %v976_v28 = vmul.f32 %v975_v34, %v923_v35  ;;  %v991_v36 = vstv %s2679_s30 }
 0x210   : >> { %942 = vrot.lane.b32.xlu0 %v940_v10, %s2061_s19  ;;  %s924_s27 = sld [smem:[#allocation13 + %s921_s20]]  ;;  %s982_s17 = sadd.s32 147, %s2665_s4  ;;  %v1000_v12 = vstv %s2682_s5 }
 0x211   : >> { %960 = vrot.lane.b32.xlu1 %v958_v2, %s2062_s0  ;;  %s983_s11 = scalar_lea.vmem [#allocation5], %s2032_s1  ;;  %s1035_s6 = sld [smem:[#allocation13 + %s1034_s22]]  ;;  %v1009_v33 = vstv %s2687_s8 }
 0x212   : >> { %v984_v23 = vld [vmem:[%s983_s11] sm:$0xff]  ;;  %s985_s7 = sld [smem:[#allocation13 + %s982_s17]]  ;;  %s2063_s23 = smov 123  }
 0x213   : >> { %s2064_s10 = smov 122   ;;  %v992_v46 = vmul.f32 %v991_v36, %v984_v23  ;;  %v1001_v27 = vmul.f32 %v1000_v12, %v984_v23  ;;  %v1018_v50 = vstv %s2691_s28  ;;  %s2975_s20 = smov 127   ;;  %v1010_v14 = vmul.f32 %v1009_v33, %v984_v23 }
 0x214   : >> { %969 = vrot.lane.b32.xlu0 %v967_v32, %s2063_s23  ;;  %v1019_v21 = vmul.f32 %v1018_v50, %v984_v23  ;;  %v1027_v55 = vstv %s2696_s9  ;;  %s2976_s4 = smov 125   ;;  %s918_s1 = sadd.s32 1, %s2032_s1  }
 0x215   : >> { %978 = vrot.lane.b32.xlu1 %v976_v28, %s2064_s10  ;;  %v1028_v41 = vmul.f32 %v1027_v55, %v984_v23  ;;  %p915_p8 = scmp.ge.s32.totalorder %s918_s1, 7  }
 0x216   : >> { %v925_v16 = vstv %s924_s27  ;;  %s1680_s30 = sld [smem:[#allocation14 + $0x1]] (%p915_p8)  ;;  %v2718_v9 = vmov (%p915_p8), 0.0   ;;  %v2720_v56 = vmov (%p915_p8), 0.0   ;;  %s2722_s5 = smov (%p915_p8), 0  }
 0x217   : >> { %v926_v24 = vmul.f32 %v925_v16, %v923_v35  ;;  %v1036_v59 = vstv %s1035_s6 }
 0x218   : >> { %v986_v0 = vstv %s985_s7  ;;  %994 = vrot.lane.b32.xlu0 %v992_v46, %s2975_s20  ;;  %v1037_v25 = vmul.f32 %v1036_v59, %v984_v23 }
 0x219   : >> { %1003 = vrot.lane.b32.xlu1 %v1001_v27, %s2061_s19  ;;  %v987_v5 = vmul.f32 %v986_v0, %v984_v23  ;;  %v927_v19 = vadd.f32 %v2028_v42, %v926_v24 }
 0x21c   : >> { %1012 = vrot.lane.b32.xlu0 %v1010_v14, %s2976_s4  ;;  %v1044_v44 = vstv (%p915_p8), %s1680_s30 }
 0x21d   : >> { %1021 = vrot.lane.b32.xlu1 %v1019_v21, %s2062_s0 }
 0x220   : >> { %1030 = vrot.lane.b32.xlu0 %v1028_v41, %s2063_s23 }
 0x221   : >> { %1039 = vrot.lane.b32.xlu1 %v1037_v25, %s2064_s10 }
 0x27e   : >> { %v934_v30 = vpop.permute.xlu0 %933 }
 0x27f   : >> { %v952_v38 = vpop.permute.xlu1 %951  ;;  %v936_v1 = vadd.f32 %v934_v30, %v927_v19 }
 0x282   : >> { %v943_v31 = vpop.permute.xlu0 %942 }
 0x283   : >> { %v961_v18 = vpop.permute.xlu1 %960  ;;  %v945_v37 = vadd.f32 %v943_v31, %v936_v1 }
 0x285   : >> { %v954_v63 = vadd.f32 %v952_v38, %v945_v37 }
 0x286   : >> { %v970_v45 = vpop.permute.xlu0 %969 }
 0x287   : >> { %v979_v58 = vpop.permute.xlu1 %978  ;;  %v963_v40 = vadd.f32 %v961_v18, %v954_v63 }
 0x289   : >> { %v972_v43 = vadd.f32 %v970_v45, %v963_v40 }
 0x28a   : >> { %v995_v3 = vpop.permute.xlu0 %994 }
 0x28b   : >> { %v1004_v8 = vpop.permute.xlu1 %1003  ;;  %v981_v51 = vadd.f32 %v979_v58, %v972_v43 }
 0x28d   : >> { %v988_v39 = vadd.f32 %v987_v5, %v981_v51 }
 0x28e   : >> { %v1013_v49 = vpop.permute.xlu0 %1012 }
 0x28f   : >> { %v997_v47 = vadd.f32 %v995_v3, %v988_v39  ;;  %v1022_v54 = vpop.permute.xlu1 %1021 }
 0x291   : >> { %v1006_v60 = vadd.f32 %v1004_v8, %v997_v47 }
 0x292   : >> { %v1031_v53 = vpop.permute.xlu0 %1030 }
 0x293   : >> { %v1015_v4 = vadd.f32 %v1013_v49, %v1006_v60  ;;  %v1040_v48 = vpop.permute.xlu1 %1039 }
 0x295   : >> { %v1024_v11 = vadd.f32 %v1022_v54, %v1015_v4  ;;  %917 = sbr.rel (!%p915_p8) target bundleno = 512 (0x200), region = 125 }
 0x297   : >> { %v1033_v62 = vadd.f32 %v1031_v53, %v1024_v11 }
 0x299   : >> { %v1042_v15 = vadd.f32 %v1040_v48, %v1033_v62  }
 0x29b   : >> { %v2977_v42 = vmov %v1042_v15  ;;  %v1045_v29 = vadd.f32 (%p915_p8), %v1044_v44, %v1042_v15 }
 0x29d   : > { %v1681_v57 = vmul.f32 -1.442695, %v1045_v29 }
 0x29f   : > { %1844 = vpow2.f32 %v1681_v57 }
 0x2a9   : > { %v1845_v17 = vpop.eup %1844 }
 0x2aa   : > { %v1049_v13 = vadd.f32 1.0, %v1845_v17 }
 0x2ac   : > { %1846 = vrcp.f32 %v1049_v13 }
 0x2b6   : > { %v1847_v42 = vpop.eup %1846 }
 0x2b7   : > { %v2716_v35 = vmul.f32 %v1847_v42, %v1045_v29 }
 0x2b8 LB: >> { %s2734_s1 = smul.u32 7, %s2044_s5  ;;  %s1063_s0 = scalar_lea.vmem [#allocation6], %s2044_s5  ;;  %s2044_s5 = sphi %s2722_s5, %s1058_s5   ;;  %v2040_v56 = vphi %v2720_v56, %v2979_v56   ;;  %v2036_v9 = vphi %v2718_v9, %v2978_v9  }
 0x2b9   : >> { %v1064_v20 = vld [vmem:[%s1063_s0] sm:$0xff]  ;;  %v1065_v7 = vld [vmem:[%s1063_s0 + $0x8] sm:$0xff]  ;;  %s2065_s11 = smov 126   ;;  %s2066_s6 = smov 127  }
 0x2ba   : >> { %s1087_s10 = sadd.s32 198, %s2734_s1  ;;  %s1072_s7 = sadd.s32 197, %s2734_s1 }
 0x2bb   : >> { %s1088_s8 = sld [smem:[#allocation13 + %s1087_s10]]  ;;  %s1102_s22 = sadd.s32 199, %s2734_s1 }
 0x2bc   : >> { %s1073_s28 = sld [smem:[#allocation13 + %s1072_s7]]  ;;  %s1117_s19 = sadd.s32 200, %s2734_s1 }
 0x2bd   : >> { %s1103_s9 = sld [smem:[#allocation13 + %s1102_s22]]  ;;  %s1132_s17 = sadd.s32 201, %s2734_s1 }
 0x2be   : >> { %s1118_s27 = sld [smem:[#allocation13 + %s1117_s19]]  ;;  %s1147_s20 = sadd.s32 202, %s2734_s1 }
 0x2bf   : >> { %s2744_s23 = sld [smem:[#allocation13 + %s1132_s17]]  ;;  %s1062_s4 = sadd.s32 196, %s2734_s1 }
 0x2c0   : >> { %s1066_s30 = sld [smem:[#allocation13 + %s1062_s4]]  ;;  %s1162_s10 = sadd.s32 245, %s2734_s1 }
 0x2c1   : >> { %v1089_v61 = vstv %s1088_s8  ;;  %s2751_s7 = sld [smem:[#allocation13 + %s1147_s20]]  ;;  %s2067_s22 = smov 125  }
 0x2c2   : >> { %v1074_v52 = vstv %s1073_s28  ;;  %v1090_v10 = vmul.f32 %v1089_v61, %v1064_v20  ;;  %v1091_v26 = vmul.f32 %v1089_v61, %v1065_v7  ;;  %s1166_s8 = sld [smem:[#allocation13 + %s1162_s10]]  ;;  %s1172_s28 = sadd.s32 246, %s2734_s1 }
 0x2c3   : >> { %v1075_v2 = vmul.f32 %v1074_v52, %v1064_v20  ;;  %v1076_v34 = vmul.f32 %v1074_v52, %v1065_v7  ;;  %v1104_v32 = vstv %s1103_s9  ;;  %s2757_s9 = sld [smem:[#allocation13 + %s1172_s28]]  ;;  %s1187_s19 = sadd.s32 247, %s2734_s1 }
 0x2c4   : >> { %1094 = vrot.lane.b32.xlu1 %v1090_v10, %s2065_s11  ;;  %v1106_v28 = vmul.f32 %v1104_v32, %v1065_v7  ;;  %v1105_v23 = vmul.f32 %v1104_v32, %v1064_v20  ;;  %v1119_v36 = vstv %s1118_s27  ;;  %s1163_s0 = scalar_lea.vmem [#allocation7], %s2044_s5  ;;  %s2068_s27 = smov 124  }
 0x2c5   : >> { %1079 = vrot.lane.b32.xlu0 %v1075_v2, %s2066_s6  ;;  %v1121_v12 = vmul.f32 %v1119_v36, %v1065_v7  ;;  %v1120_v46 = vmul.f32 %v1119_v36, %v1064_v20  ;;  %v1134_v27 = vstv %s2744_s23  ;;  %v1165_v16 = vld [vmem:[%s1163_s0 + $0x8] sm:$0xff]  ;;  %v1164_v24 = vld [vmem:[%s1163_s0] sm:$0xff]  ;;  %s1188_s17 = sld [smem:[#allocation13 + %s1187_s19]]  ;;  %s1202_s23 = sadd.s32 248, %s2734_s1 }
 0x2c6   : >> { %v1067_v33 = vstv %s1066_s30  ;;  %v1136_v50 = vmul.f32 %v1134_v27, %v1065_v7  ;;  %v1135_v5 = vmul.f32 %v1134_v27, %v1064_v20  ;;  %s2069_s20 = smov 123   ;;  %s1203_s4 = sld [smem:[#allocation13 + %s1202_s23]] }
 0x2c7   : >> { %v1068_v0 = vmul.f32 %v1067_v33, %v1064_v20  ;;  %v1069_v14 = vmul.f32 %v1067_v33, %v1065_v7  ;;  %v1149_v41 = vstv %s2751_s7  ;;  %s1217_s30 = sadd.s32 249, %s2734_s1  ;;  %s2070_s10 = smov 122  }
 0x2c8   : >> { %1096 = vrot.lane.b32.xlu1 %v1091_v26, %s2065_s11  ;;  %v1167_v21 = vstv %s1166_s8  ;;  %v1151_v25 = vmul.f32 %v1149_v41, %v1065_v7  ;;  %v1150_v19 = vmul.f32 %v1149_v41, %v1064_v20  ;;  %s1218_s7 = sld [smem:[#allocation13 + %s1217_s30]]  ;;  %s1232_s8 = sadd.s32 250, %s2734_s1 }
 0x2c9   : >> { %1081 = vrot.lane.b32.xlu0 %v1076_v34, %s2066_s6  ;;  %v2763_v55 = vmul.f32 %v1167_v21, %v1165_v16  ;;  %v2765_v59 = vmul.f32 %v1167_v21, %v1164_v24  ;;  %v1174_v30 = vstv %s2757_s9  ;;  %s1233_s28 = sld [smem:[#allocation13 + %s1232_s8]]  ;;  %s1247_s9 = sadd.s32 251, %s2734_s1  ;;  %v1071_v53 = vadd.f32 %v2036_v9, %v1069_v14 }
 0x2ca   : >> { %v1176_v38 = vmul.f32 %v1174_v30, %v1165_v16  ;;  %v1175_v1 = vmul.f32 %v1174_v30, %v1164_v24  ;;  %s1248_s19 = sld [smem:[#allocation13 + %s1247_s9]]  ;;  %v1070_v62 = vadd.f32 %v2040_v56, %v1068_v0  ;;  %s1058_s5 = sadd.s32 1, %s2044_s5  }
 0x2cb   : >> { %v1189_v31 = vstv %s1188_s17  ;;  %p1055_p10 = scmp.ge.s32.totalorder %s1058_s5, 7  }
 0x2cc   : >> { %1111 = vrot.lane.b32.xlu1 %v1106_v28, %s2067_s22  ;;  %v1191_v18 = vmul.f32 %v1189_v31, %v1165_v16  ;;  %v1190_v37 = vmul.f32 %v1189_v31, %v1164_v24  ;;  %v1204_v63 = vstv %s1203_s4  ;;  %s1682_s5 = sld [smem:[#allocation14 + $0x2]] (%p1055_p10)  ;;  %s1691_s1 = sshll.u32 (%p1055_p10), %s2116_s16, 11 }
 0x2cd   : >> { %1109 = vrot.lane.b32.xlu0 %v1105_v23, %s2067_s22  ;;  %v1206_v45 = vmul.f32 %v1204_v63, %v1165_v16  ;;  %v1205_v58 = vmul.f32 %v1204_v63, %v1164_v24  ;;  %s2884_s0 = scalar_lea.hbm (%p1055_p10), %s2937_s3, %s1691_s1  ;;  %s1523_s16 = scalar_lea.sflag (%p1055_p10), [#allocation10], %s2249_s29 }
 0x2ce   : >> { %v1219_v40 = vstv %s1218_s7  ;;  %p2980_p6 = scmp.ne.s32.totalorder (%p1055_p10), %s2953_s24, 0  ;;  %s2072_s17 = smov (%p1055_p10), [#allocation15]  }
 0x2cf   : >> { %v1221_v43 = vmul.f32 %v1219_v40, %v1165_v16  ;;  %v1220_v3 = vmul.f32 %v1219_v40, %v1164_v24  ;;  %v1234_v8 = vstv %s1233_s28  ;;  %v1343_v40 = vsub.s32 (%p1055_p10), 1, %v2497_v6  ;;  %s1918_s23 = sshll.u32 (%p1055_p10), %s2072_s17, 4  ;;  %s1919_s23 = int_to_ptr.vmem [resolvable:$false] %s1918_s23 }
 0x2d0   : >> { %1126 = vrot.lane.b32.xlu1 %v1121_v12, %s2068_s27  ;;  %v1236_v51 = vmul.f32 %v1234_v8, %v1165_v16  ;;  %v1235_v39 = vmul.f32 %v1234_v8, %v1164_v24  ;;  %v1249_v49 = vstv %s1248_s19 }
 0x2d1   : >> { %1124 = vrot.lane.b32.xlu0 %v1120_v46, %s2068_s27  ;;  %v1251_v47 = vmul.f32 %v1249_v49, %v1165_v16  ;;  %v1250_v54 = vmul.f32 %v1249_v49, %v1164_v24  ;;  %v1365_v49 = vsub.s32 (%p1055_p10), 3, %v2497_v6 }
 0x2d4   : >> { %1141 = vrot.lane.b32.xlu1 %v1136_v50, %s2069_s20 }
 0x2d5   : >> { %1139 = vrot.lane.b32.xlu0 %v1135_v5, %s2069_s20 }
 0x2d8   : >> { %1156 = vrot.lane.b32.xlu1 %v1151_v25, %s2070_s10 }
 0x2d9   : >> { %1154 = vrot.lane.b32.xlu0 %v1150_v19, %s2070_s10 }
 0x2dc   : >> { %1181 = vrot.lane.b32.xlu1 %v1176_v38, %s2066_s6 }
 0x2dd   : >> { %1179 = vrot.lane.b32.xlu0 %v1175_v1, %s2066_s6 }
 0x2e0   : >> { %1196 = vrot.lane.b32.xlu1 %v1191_v18, %s2065_s11 }
 0x2e1   : >> { %1194 = vrot.lane.b32.xlu0 %v1190_v37, %s2065_s11  ;;  %s1536_s11 = sshll.u32 (%p1055_p10), %s2591_s26, 4  ;;  %s2886_s11 = int_to_ptr.vmem [resolvable:$true] %s1536_s11 }
 0x2e2   : > { %p1921_p7 = scmp.lt.s32.totalorder (%p1055_p10), %s2886_s11, %s1919_s23 }
 0x2e4   : >> { %1211 = vrot.lane.b32.xlu1 %v1206_v45, %s2067_s22 }
 0x2e5   : >> { %1209 = vrot.lane.b32.xlu0 %v1205_v58, %s2067_s22 }
 0x2e8   : >> { %1226 = vrot.lane.b32.xlu1 %v1221_v43, %s2068_s27  ;;  %v2802_v43 = vsub.s32 (%p1055_p10), 0, %v2497_v6 }
 0x2e9   : >> { %1224 = vrot.lane.b32.xlu0 %v1220_v3, %s2068_s27  ;;  %v1344_v3 = vrot.slane (%p1055_p10), %v2716_v35, %v1343_v40  ;;  %s1914_s27 = scalar_lea.vmem (%p1055_p10), %s2886_s11, 2048 }
 0x2ea   : > { %v1333_v8 = vrot.slane (%p1055_p10), %v2716_v35, %v2802_v43  ;;  %p1915_p4 = scmp.ne.s32.totalorder (%p1055_p10), %s2886_s11, %s1914_s27 }
 0x2ec   : >> { %1241 = vrot.lane.b32.xlu1 %v1236_v51, %s2069_s20  ;;  %v1354_v51 = vsub.s32 (%p1055_p10), 2, %v2497_v6  ;;  %p1916_p12 = pnand (%p1055_p10), %p1915_p4, %p2980_p6 }
 0x2ed   : >> { %1239 = vrot.lane.b32.xlu0 %v1235_v39, %s2069_s20  ;;  %s1920_s20 = scalar_lea.vmem (%p1055_p10), %s1919_s23, 4096 }
 0x2ee   : > { %v1355_v39 = vrot.slane (%p1055_p10), %v2716_v35, %v1354_v51  ;;  %p1917_p1 = pneg (%p1055_p10), %p1916_p12  ;;  %p1922_p11 = scmp.lt.s32.totalorder (%p1055_p10), %s1920_s20, %s1914_s27 }
 0x2f0   : >> { %1256 = vrot.lane.b32.xlu1 %v1251_v47, %s2070_s10  ;;  %v1366_v47 = vrot.slane (%p1055_p10), %v2716_v35, %v1365_v49  ;;  %p1923_p13 = por (%p1055_p10), %p1922_p11, %p1921_p7 }
 0x2f1   : >> { %1254 = vrot.lane.b32.xlu0 %v1250_v54, %s2070_s10  ;;  %v1376_v54 = vsub.s32 (%p1055_p10), 4, %v2497_v6 }
 0x2f2   : > { %p1924_p3 = pnand (%p1055_p10), %p1923_p13, %p1917_p1 }
 0x2f4   : > { %1346 = vbcast.lane.b32.xlu1 (%p1055_p10), %v1344_v3, 256 }
 0x2f5   : > { %1335 = vbcast.lane.b32.xlu0 (%p1055_p10), %v1333_v8, 256 }
 0x2f8   : > { %1350 = vbcast.lane.b32.xlu1 (%p1055_p10), %v1344_v3, 264 }
 0x2f9   : > { %1339 = vbcast.lane.b32.xlu0 (%p1055_p10), %v1333_v8, 264 }
 0x2fc   : > { %1361 = vbcast.lane.b32.xlu1 (%p1055_p10), %v1355_v39, 264 }
 0x2fd   : > { %1357 = vbcast.lane.b32.xlu0 (%p1055_p10), %v1355_v39, 256 }
 0x300   : > { %1372 = vbcast.lane.b32.xlu1 (%p1055_p10), %v1366_v47, 264 }
 0x301   : > { %1368 = vbcast.lane.b32.xlu0 (%p1055_p10), %v1366_v47, 256 }
 0x336   : >> { %v1095_v60 = vpop.permute.xlu1 %1094 }
 0x337   : >> { %v1080_v4 = vpop.permute.xlu0 %1079 }
 0x338   : >> { %v1085_v57 = vadd.f32 %v1080_v4, %v1070_v62  ;;  %v1387_v4 = vsub.s32 (%p1055_p10), 5, %v2497_v6  ;;  %v1409_v62 = vsub.s32 (%p1055_p10), 7, %v2497_v6 }
 0x33a   : >> { %v1097_v11 = vpop.permute.xlu1 %1096  ;;  %v1100_v20 = vadd.f32 %v1095_v60, %v1085_v57  ;;  %v1377_v60 = vrot.slane (%p1055_p10), %v2716_v35, %v1376_v54 }
 0x33b   : >> { %v1082_v48 = vpop.permute.xlu0 %1081 }
 0x33c   : >> { %v1086_v15 = vadd.f32 %v1082_v48, %v1071_v53  ;;  %1383 = vbcast.lane.b32.xlu1 (%p1055_p10), %v1377_v60, 264  ;;  %1379 = vbcast.lane.b32.xlu0 (%p1055_p10), %v1377_v60, 256  ;;  %v1388_v53 = vrot.slane (%p1055_p10), %v2716_v35, %v1387_v4 }
 0x33e   : >> { %v1112_v44 = vpop.permute.xlu1 %1111  ;;  %v1101_v17 = vadd.f32 %v1097_v11, %v1086_v15  ;;  %v1398_v11 = vsub.s32 (%p1055_p10), 6, %v2497_v6  ;;  %v1410_v15 = vrot.slane (%p1055_p10), %v2716_v35, %v1409_v62 }
 0x33f   : >> { %v1110_v29 = vpop.permute.xlu0 %1109 }
 0x340   : >> { %v1116_v7 = vadd.f32 %v1112_v44, %v1101_v17  ;;  %v1115_v61 = vadd.f32 %v1110_v29, %v1100_v20  ;;  %1394 = vbcast.lane.b32.xlu1 (%p1055_p10), %v1388_v53, 264  ;;  %1390 = vbcast.lane.b32.xlu0 (%p1055_p10), %v1388_v53, 256  ;;  %v1399_v48 = vrot.slane (%p1055_p10), %v2716_v35, %v1398_v11  ;;  %v1263_v44 = vstv (%p1055_p10), %s1682_s5 }
 0x342   : >> { %v1127_v13 = vpop.permute.xlu1 %1126 }
 0x343   : >> { %v1125_v42 = vpop.permute.xlu0 %1124  ;;  %v1131_v2 = vadd.f32 %v1127_v13, %v1116_v7 }
 0x344   : >> { %v1130_v26 = vadd.f32 %v1125_v42, %v1115_v61  ;;  %1405 = vbcast.lane.b32.xlu1 (%p1055_p10), %v1399_v48, 264  ;;  %1401 = vbcast.lane.b32.xlu0 (%p1055_p10), %v1399_v48, 256  ;;  %v2071_v42 = vmov (%p1055_p10), 1966171168  }
 0x345   : > { %v1283_v20 = vunpack.c.l.s4 (%p1055_p10), %v2071_v42 }
 0x346   : >> { %v1142_v52 = vpop.permute.xlu1 %1141 }
 0x347   : >> { %v1140_v10 = vpop.permute.xlu0 %1139  ;;  %v1146_v34 = vadd.f32 %v1142_v52, %v1131_v2  ;;  %v1284_v7 = vunpack.c.0.s8 (%p1055_p10), %v1283_v20 }
 0x348   : >> { %v1145_v9 = vadd.f32 %v1140_v10, %v1130_v26  ;;  %1416 = vbcast.lane.b32.xlu1 (%p1055_p10), %v1410_v15, 264  ;;  %1412 = vbcast.lane.b32.xlu0 (%p1055_p10), %v1410_v15, 256 }
 0x349   : > { %v1287_v52 = vsub.s32 (%p1055_p10), %v1284_v7, %v2497_v6 }
 0x34a   : >> { %v1157_v32 = vpop.permute.xlu1 %1156 }
 0x34b   : >> { %v1155_v28 = vpop.permute.xlu0 %1154  ;;  %v1161_v23 = vadd.f32 %v1157_v32, %v1146_v34  ;;  %v1288_v35 = vrot.slane (%p1055_p10), %v2652_v22, %v1287_v52 }
 0x34c   : >> { %v1160_v56 = vadd.f32 %v1155_v28, %v1145_v9 }
 0x34d   : >> { %v1171_v36 = vadd.f32 %v2763_v55, %v1161_v23  ;;  %v1296_v34 = vcombine.high (%p1055_p10), %v1288_v35, %v1288_v35  ;;  %v1304_v32 = vrot.slane (%p1055_p10), %v1288_v35, %v1287_v52 }
 0x34e   : >> { %v1170_v12 = vadd.f32 %v2765_v59, %v1160_v56  ;;  %v1182_v46 = vpop.permute.xlu1 %1181 }
 0x34f   : >> { %v1180_v27 = vpop.permute.xlu0 %1179  ;;  %v1186_v0 = vadd.f32 %v1182_v46, %v1171_v36 }
 0x350   : >> { %v1185_v14 = vadd.f32 %v1180_v27, %v1170_v12  ;;  %v1326_v27 = vcombine.high (%p1055_p10), %v1304_v32, %v1304_v32 }
 0x352   : >> { %v1197_v33 = vpop.permute.xlu1 %1196 }
 0x353   : >> { %v1195_v50 = vpop.permute.xlu0 %1194  ;;  %v1201_v41 = vadd.f32 %v1197_v33, %v1186_v0  ;;  %v1281_v33 = vcombine.high (%p1055_p10), %v2652_v22, %v2652_v22 }
 0x354   : >> { %v1200_v25 = vadd.f32 %v1195_v50, %v1185_v14 }
 0x356   : >> { %v1212_v16 = vpop.permute.xlu1 %1211 }
 0x357   : >> { %v1210_v24 = vpop.permute.xlu0 %1209  ;;  %v1216_v19 = vadd.f32 %v1212_v16, %v1201_v41  ;;  %v1429_v41 = vrot.slane (%p1055_p10), %v1326_v27, %v2802_v43 }
 0x358   : >> { %v1215_v30 = vadd.f32 %v1210_v24, %v1200_v25 }
 0x35a   : >> { %v1227_v21 = vpop.permute.xlu1 %1226 }
 0x35b   : >> { %v1225_v5 = vpop.permute.xlu0 %1224  ;;  %v1231_v31 = vadd.f32 %v1227_v21, %v1216_v19  ;;  %v1295_v19 = vrot.slane (%p1055_p10), %v1281_v33, %v1287_v52 }
 0x35c   : >> { %v1230_v55 = vadd.f32 %v1225_v5, %v1215_v30 }
 0x35e   : >> { %v1242_v38 = vpop.permute.xlu1 %1241 }
 0x35f   : >> { %v1240_v1 = vpop.permute.xlu0 %1239  ;;  %v1246_v18 = vadd.f32 %v1242_v38, %v1231_v31 }
 0x360   : >> { %v1245_v59 = vadd.f32 %v1240_v1, %v1230_v55  ;;  %1057 = sbr.rel (!%p1055_p10) target bundleno = 696 (0x2b8), region = 136 }
 0x362   : >> { %v1257_v37 = vpop.permute.xlu1 %1256 }
 0x363   : >> { %v1255_v63 = vpop.permute.xlu0 %1254  ;;  %v1261_v45 = vadd.f32 %v1257_v37, %v1246_v18  }
 0x364   : >> { %v1260_v58 = vadd.f32 %v1255_v63, %v1245_v59   ;;  %v1311_v63 = vrot.slane (%p1055_p10), %v1295_v19, %v1287_v52 }
 0x365   : >> { %v2978_v9 = vmov %v1261_v45  ;;  %v1265_v17 = vadd.f32 (%p1055_p10), %v1263_v44, %v1261_v45  ;;  %v1297_v45 = vcombine.high (%p1055_p10), %v1295_v19, %v1295_v19 }
 0x366   : >> { %v2979_v56 = vmov %v1260_v58  ;;  %v1264_v29 = vadd.f32 (%p1055_p10), %v1263_v44, %v1260_v58  ;;  %v1318_v9 = vrot.slane (%p1055_p10), %v1296_v34, %v1287_v52  ;;  %v1347_v46 = vpop.permute.xlu1 (%p1055_p10), %1346  ;;  %v1437_v54 = vrot.slane (%p1055_p10), %v1311_v63, %v2802_v43 }
 0x367   : > { %v1684_v13 = vmul.f32 -1.442695, %v1265_v17  ;;  %v1421_v56 = vrot.slane %v1304_v32, %v2802_v43  ;;  %v1336_v6 = vpop.permute.xlu0 %1335  ;;  %v1325_v60 = vrot.slane %v1297_v45, %v1287_v52 }
 0x368   : > { %v1683_v57 = vmul.f32 -1.442695, %v1264_v29  ;;  %v1425_v23 = vrot.slane %v1318_v9, %v2802_v43  ;;  %v1328_v25 = vcombine.high %v1318_v9, %v1318_v9 }
 0x369   : > { %v1458_v16 = vadd.f32 %v1421_v56, %v1336_v6 }
 0x36a   : > { %1848 = vpow2.f32 %v1683_v57  ;;  %v1460_v50 = vadd.f32 %v1425_v23, %v1347_v46  ;;  %v1351_v21 = vpop.permute.xlu1 %1350  ;;  %v1433_v37 = vrot.slane %v1328_v25, %v2802_v43  ;;  %v1441_v57 = vrot.slane %v1325_v60, %v2802_v43 }
 0x36b   : > { %1850 = vpow2.f32 %v1684_v13  ;;  %v1340_v5 = vpop.permute.xlu0 %1339  ;;  %v1461_v1 = vadd.f32 %v1425_v23, %v1351_v21 }
 0x36c   : > { %v1459_v22 = vadd.f32 %v1421_v56, %v1340_v5 }
 0x36e   : > { %v1362_v18 = vpop.permute.xlu1 %1361 }
 0x36f   : > { %v1358_v59 = vpop.permute.xlu0 %1357  ;;  %v1463_v3 = vadd.f32 %v1429_v41, %v1362_v18 }
 0x370   : > { %v1462_v8 = vadd.f32 %v1429_v41, %v1358_v59 }
 0x372   : > { %v1373_v49 = vpop.permute.xlu1 %1372 }
 0x373   : > { %v1369_v47 = vpop.permute.xlu0 %1368  ;;  %v1465_v11 = vadd.f32 %v1433_v37, %v1373_v49 }
 0x374   : > { %v1849_v61 = vpop.eup %1848  ;;  %v1464_v48 = vadd.f32 %v1433_v37, %v1369_v47 }
 0x375   : > { %v1272_v10 = vadd.f32 1.0, %v1849_v61  ;;  %v1851_v2 = vpop.eup %1850 }
 0x376   : > { %v1273_v26 = vadd.f32 1.0, %v1851_v2 }
 0x377   : > { %1852 = vrcp.f32 %v1272_v10 }
 0x378   : > { %1854 = vrcp.f32 %v1273_v26  ;;  %v1329_v26 = vcombine.high %v1325_v60, %v1325_v60 }
 0x37a   : > { %v1449_v6 = vrot.slane %v1329_v26, %v2802_v43 }
 0x381   : > { %v1853_v28 = vpop.eup %1852 }
 0x382   : > { %v2823_v36 = vmul.f32 %v1853_v28, %v1264_v29  ;;  %v1855_v12 = vpop.eup %1854 }
 0x383   : > { %v2829_v14 = vmul.f32 %v1855_v12, %v1265_v17  ;;  %v1327_v17 = vcombine.high %v1311_v63, %v1311_v63 }
 0x384   : > { %v1476_v24 = vadd.f32 %v1460_v50, %v2823_v36  ;;  %v1474_v0 = vadd.f32 %v1458_v16, %v2823_v36  ;;  %v1478_v39 = vadd.f32 %v1462_v8, %v2823_v36  ;;  %v1480_v15 = vadd.f32 %v1464_v48, %v2823_v36 }
 0x385   : > { %v1477_v31 = vadd.f32 %v1461_v1, %v2829_v14  ;;  %v1475_v55 = vadd.f32 %v1459_v22, %v2829_v14  ;;  %v1479_v51 = vadd.f32 %v1463_v3, %v2829_v14  ;;  %v1481_v62 = vadd.f32 %v1465_v11, %v2829_v14 }
 0x386   : > { %v1492_v30 = vmul.f32 0.33333334, %v1476_v24  ;;  %v1490_v38 = vmul.f32 0.33333334, %v1474_v0  ;;  %v1494_v53 = vmul.f32 0.33333334, %v1478_v39  ;;  %v1445_v35 = vrot.slane %v1327_v17, %v2802_v43 }
 0x387   : > { %v1493_v58 = vmul.f32 0.33333334, %v1477_v31  ;;  %v1491_v40 = vmul.f32 0.33333334, %v1475_v55  ;;  %v1495_v4 = vmul.f32 0.33333334, %v1479_v51 }
 0x388   : > { %1508 = vst.msk [vmem:[%s2591_s26 + $0x10] sm:$0xff] %vm230_vm0, %v1492_v30  ;;  %1506 = vst.msk [vmem:[%s2591_s26] sm:$0xff] %vm230_vm0, %v1490_v38  ;;  %v1497_v13 = vmul.f32 0.33333334, %v1481_v62  ;;  %v1496_v42 = vmul.f32 0.33333334, %v1480_v15 }
 0x389   : > { %1509 = vst.msk [vmem:[%s2591_s26 + $0x18] sm:$0xff] %vm230_vm0, %v1493_v58  ;;  %1507 = vst.msk [vmem:[%s2591_s26 + $0x8] sm:$0xff] %vm230_vm0, %v1491_v40 }
 0x38a   : > { %1511 = vst.msk [vmem:[%s2591_s26 + $0x28] sm:$0xff] %vm230_vm0, %v1495_v4  ;;  %1510 = vst.msk [vmem:[%s2591_s26 + $0x20] sm:$0xff] %vm230_vm0, %v1494_v53 }
 0x38b   : > { %1513 = vst.msk [vmem:[%s2591_s26 + $0x38] sm:$0xff] %vm230_vm0, %v1497_v13  ;;  %1512 = vst.msk [vmem:[%s2591_s26 + $0x30] sm:$0xff] %vm230_vm0, %v1496_v42 }
 0x3ae   : > { %v1384_v44 = vpop.permute.xlu1 %1383  ;;  %v1380_v29 = vpop.permute.xlu0 %1379 }
 0x3af   : > { %v1467_v20 = vadd.f32 %v1437_v54, %v1384_v44  ;;  %v1466_v7 = vadd.f32 %v1437_v54, %v1380_v29 }
 0x3b1   : > { %v1483_v61 = vadd.f32 %v1467_v20, %v2829_v14  ;;  %v1482_v52 = vadd.f32 %v1466_v7, %v2823_v36 }
 0x3b2   : > { %v1395_v10 = vpop.permute.xlu1 %1394  ;;  %v1391_v2 = vpop.permute.xlu0 %1390 }
 0x3b3   : > { %v1499_v34 = vmul.f32 0.33333334, %v1483_v61  ;;  %v1498_v9 = vmul.f32 0.33333334, %v1482_v52  ;;  %v1469_v32 = vadd.f32 %v1441_v57, %v1395_v10  ;;  %v1468_v28 = vadd.f32 %v1441_v57, %v1391_v2 }
 0x3b5   : > { %1515 = vst.msk [vmem:[%s2591_s26 + $0x48] sm:$0xff] %vm230_vm0, %v1499_v34  ;;  %1514 = vst.msk [vmem:[%s2591_s26 + $0x40] sm:$0xff] %vm230_vm0, %v1498_v9  ;;  %v1485_v23 = vadd.f32 %v1469_v32, %v2829_v14  ;;  %v1484_v56 = vadd.f32 %v1468_v28, %v2823_v36 }
 0x3b6   : > { %v1406_v12 = vpop.permute.xlu1 %1405  ;;  %v1402_v46 = vpop.permute.xlu0 %1401 }
 0x3b7   : > { %v1501_v27 = vmul.f32 0.33333334, %v1485_v23  ;;  %v1500_v33 = vmul.f32 0.33333334, %v1484_v56  ;;  %v1471_v50 = vadd.f32 %v1445_v35, %v1406_v12  ;;  %v1470_v16 = vadd.f32 %v1445_v35, %v1402_v46 }
 0x3b9   : > { %1517 = vst.msk [vmem:[%s2591_s26 + $0x58] sm:$0xff] %vm230_vm0, %v1501_v27  ;;  %1516 = vst.msk [vmem:[%s2591_s26 + $0x50] sm:$0xff] %vm230_vm0, %v1500_v33  ;;  %v1487_v24 = vadd.f32 %v1471_v50, %v2829_v14  ;;  %v1486_v0 = vadd.f32 %v1470_v16, %v2823_v36 }
 0x3ba   : > { %v1417_v21 = vpop.permute.xlu1 %1416  ;;  %v1413_v5 = vpop.permute.xlu0 %1412 }
 0x3bb   : > { %v1503_v43 = vmul.f32 0.33333334, %v1487_v24  ;;  %v1502_v41 = vmul.f32 0.33333334, %v1486_v0  ;;  %v1473_v25 = vadd.f32 %v1449_v6, %v1417_v21  ;;  %v1472_v19 = vadd.f32 %v1449_v6, %v1413_v5 }
 0x3bd   : > { %1519 = vst.msk [vmem:[%s2591_s26 + $0x68] sm:$0xff] %vm230_vm0, %v1503_v43  ;;  %1518 = vst.msk [vmem:[%s2591_s26 + $0x60] sm:$0xff] %vm230_vm0, %v1502_v41  ;;  %v1489_v30 = vadd.f32 %v1473_v25, %v2829_v14  ;;  %v1488_v38 = vadd.f32 %v1472_v19, %v2823_v36 }
 0x3bf   : > { %v1505_v1 = vmul.f32 0.33333334, %v1489_v30  ;;  %v1504_v22 = vmul.f32 0.33333334, %v1488_v38 }
 0x3c1   : > { %1521 = vst.msk [vmem:[%s2591_s26 + $0x78] sm:$0xff] %vm230_vm0, %v1505_v1  ;;  %1520 = vst.msk [vmem:[%s2591_s26 + $0x70] sm:$0xff] %vm230_vm0, %v1504_v22 }
 0x3c2   : > { %1927 = shalt.err (!%p1924_p3)
}
 0x3c3   : > { %s1928_s26 = scalar_lea.hbm %s2884_s0, 2048  ;;  %s1932_s10 = scalar_lea.hbm %s2937_s3, 4096 }
 0x3c4   : > { %p1929_p9 = scmp.ne.s32.totalorder %s2884_s0, %s1928_s26  ;;  %p1933_p0 = scmp.lt.u32.totalorder %s2884_s0, %s2937_s3 }
 0x3c5   : > { %p1934_p8 = scmp.lt.u32.totalorder %s1932_s10, %s1928_s26  ;;  %p1936_p4 = scmp.lt.u32.totalorder %s1928_s26, %s2884_s0 }
 0x3c6   : > { %p1930_p2 = pnand %p1929_p9, %p2980_p6 }
 0x3c7   : > { %p1935_p10 = por %p1934_p8, %p1933_p0 }
 0x3c8   : > { %p1931_p5 = pneg %p1930_p2 }
 0x3c9   : > { %p1937_p12 = por %p1936_p4, %p1935_p10 }
 0x3cb   : > { %p1938_p1 = pnand %p1937_p12, %p1931_p5 }
 0x3cd   : > { %1941 = shalt.err (!%p1938_p1)
}
 0x3ce   : > { %s2073_s28 = smov 128   ;;  %s2074_s9 = smov 8  }
 0x3cf   : > { %1702 = dma.vmem_to_hbm [thread:$0]  (%p2980_p6), %s2886_s11, 2048, %s2884_s0, %s1523_s16, %s2073_s28, %s2073_s28, %s2074_s9  }
 0x3d0 PF: > { %s1551_s19 = sand.u32 1, %s2004_s12   ;;  %p2981_p7 = scmp.ne.s32.totalorder %s2954_s25, 0 }
 0x3d1   : > { %p2982_p11 = scmp.ge.s32.totalorder %s2016_s15, 2  ;;  %s1552_s5 = scalar_lea.sflag [#allocation10], %s1551_s19 }
 0x3d3   : > { %p1716_p13 = pnand %p2982_p11, %p2981_p7 }
 0x3d5   : > { %1999 = dma.done.wait (!%p1716_p13), %s1552_s5, 2048  }
 0x3d6   : > { %2001 = vsyncadd (!%p1716_p13), %s1552_s5, 4294965248  ;;  %p18_p3 = scmp.ge.s32.totalorder %s2120_s18, 4   ;;  %s2983_s12 = smov %s2008_s13 }
 0x3d7   : > { %s2984_s13 = smov %s2012_s14  ;;  %s2985_s14 = smov %s2132_s21 }
 0x3d8   : > { %s2986_s15 = smov %s2120_s18  ;;  %20 = sbr.rel (!%p18_p3) target bundleno = 10 (0xa), region = 147 }
 0x3df   :  { %1557 = vsyncpa [#allocation9], 1 }
 0x3e0   :  { %1559 = vsyncpa [#allocation9 + $0x1], 1 }
 0x3e1   :  { %1560 = vsyncpa [#allocation10], 1 }
 0x3e2   :  { %1562 = vsyncpa [#allocation10 + $0x1], 1 }
 0x3e3   :  { %1563 = vsyncpa [#allocation11], 1 }
 0x3e4   :  { %1565 = vsyncpa [#allocation11 + $0x1], 1 }
 0x3e5   :  { %1566 = vsyncpa [#allocation12], 1 }
 0x3e6   :  { %1568 = vsyncpa [#allocation12 + $0x1], 1 }

</bundles_post_ra>
